<compile_context>
chip_gen: v7x
topology: tpu7x:2x2x1
jax: 0.10.0
libtpu: 0.0.40
codegen_flags: <defaults>
</compile_context>

<pallas_src>
import jax
import jax.numpy as jnp
from jax.experimental import pallas as pl
from jax.experimental.pallas import tpu as pltpu


def _round_up(x, m):
    return ((x + m - 1) // m) * m


# --------------------------------------------------------------------------
# Kernel
# --------------------------------------------------------------------------
def _relation_kernel(feats_ref, lfeats_ref, dif_ref,
                     w1_ref, w2_ref, w3_ref, b_ref, rel_ref):
    """One grid step: TB batch elements x N_pad context rows."""
    eps = 1e-12
    tb, n, d = feats_ref.shape
    nl = lfeats_ref.shape[-1]
    jp = rel_ref.shape[-1]
    cdt = w1_ref.dtype                      # MXU compute dtype (bf16 or f32)

    # F.normalize default dim=1 on (batch, num_cxt, feat) => L2 norm over the
    # num_cxt axis. Zero-padded context/batch rows add nothing to the
    # sum-of-squares, so the wrapper padding is transparent. Accumulate the
    # squares in f32 even for bf16 inputs; rsqrt rides the EUP slot.
    def l2norm_dim1(x):
        xf = x.astype(jnp.float32)
        ss = jnp.sum(xf * xf, axis=1, keepdims=True)          # (TB, 1, F)
        return xf * jax.lax.rsqrt(jnp.maximum(ss, eps * eps))

    feats_n = l2norm_dim1(feats_ref[...]).reshape(tb * n, d).astype(cdt)
    dif_n = l2norm_dim1(dif_ref[...]).reshape(tb * n, d).astype(cdt)
    lfeats_n = l2norm_dim1(lfeats_ref[...]).reshape(tb * n, nl)   # stays f32

    # Linear over the concatenation as a split matmul:
    #   concat([a, l, d], 1) @ Wt + b == a @ Wt1 + l @ Wt2 + d @ Wt3 + b
    acc = jnp.dot(feats_n, w1_ref[...], preferred_element_type=jnp.float32)
    acc = acc + jnp.dot(dif_n, w3_ref[...], preferred_element_type=jnp.float32)

    # K=5 lfeats chunk: 5 broadcast-FMAs on the VPU, hidden under the MXU dots.
    w2 = w2_ref[...]                         # (5, Jp), f32
    for k in range(nl):
        acc = acc + lfeats_n[:, k:k + 1] * w2[k:k + 1, :]

    acc = acc + b_ref[...]                   # (1, Jp) broadcast bias
    rel_ref[...] = acc.reshape(tb, n, jp).astype(rel_ref.dtype)


# --------------------------------------------------------------------------
# One-time weight preparation (hoisted out of the per-call path)
# --------------------------------------------------------------------------
def prepare_relation_weights(weight, bias, fc7_dim, *,
                             compute_dtype=jnp.bfloat16):
    """weight: (jemb_dim, 2*fc7_dim + 5) nn.Linear layout; bias: (jemb_dim,).

    Transposes to (in_dim, J), pads J to a multiple of 128 (lane-dense output
    stores), splits along the input dim (feats | lfeats | dif) and casts the
    two big chunks to the MXU compute dtype (bf16 default on v5e/v6e/v7x)."""
    jemb_dim, in_dim = weight.shape
    nl = in_dim - 2 * fc7_dim                        # 5
    jpad = _round_up(jemb_dim, 128)
    wt = weight.T                                    # (in_dim, J)
    bias_p = bias
    if jpad != jemb_dim:
        wt = jnp.pad(wt, ((0, 0), (0, jpad - jemb_dim)))
        bias_p = jnp.pad(bias, (0, jpad - jemb_dim))
    return {
        "w1": wt[:fc7_dim].astype(compute_dtype),                  # (D, Jp)
        "w2": wt[fc7_dim:fc7_dim + nl].astype(jnp.float32),        # (5, Jp)
        "w3": wt[fc7_dim + nl:].astype(compute_dtype),             # (D, Jp)
        "b": bias_p.reshape(1, jpad).astype(jnp.float32),          # (1, Jp)
        "jemb_dim": jemb_dim,
    }


# --------------------------------------------------------------------------
# Tiling helpers
# --------------------------------------------------------------------------
def _default_target_rows():
    # 128 MiB-VMEM parts (v5e/v6e) comfortably fit bigger activation tiles;
    # stay tighter on v7x's 64 MiB (32 MiB default scoped VMEM).
    try:
        vmem = pltpu.get_tpu_info().vmem_capacity_bytes
        if vmem >= (96 << 20):
            return 512
    except Exception:
        pass
    return 256


def _pick_batch_tile(batch, n_pad, target_rows):
    # M = tb * n_pad rows per MXU matmul. Never collapse toward tb=1 for
    # awkward batch sizes (the batch dim is padded instead), and split small
    # batches into >= 2 grid steps so both v7x TensorCores get work.
    tb = max(1, target_rows // n_pad)
    if batch > 1 and batch <= tb:
        tb = -(-batch // 2)
    return max(1, min(tb, batch))


def _vmem_bytes(tb, n_pad, d, nl, jpad, act_itemsize, w_itemsize,
                single_buffer_weights):
    wbuf = 1 if single_buffer_weights else 2
    act = 2 * tb * n_pad * d * act_itemsize * 2          # feats+dif, 2 buffers
    lf = tb * n_pad * nl * 4 * 2
    wgt = (2 * d * jpad * w_itemsize + (nl + 1) * jpad * 4) * wbuf
    out = tb * n_pad * jpad * 4 * 2
    return act + lf + wgt + out


def _build_call(batch_pad, n_pad, d, nl, jpad, tb, compiler_params,
                single_buffer_weights):
    # Constant-index weight/bias blocks are resident across the grid; single-
    # buffer them (there is nothing to double-buffer) to reclaim VMEM.
    w_kw = {"pipeline_mode": pl.Buffered(1)} if single_buffer_weights else {}
    in_specs = [
        pl.BlockSpec((tb, n_pad, d), lambda b: (b, 0, 0)),
        pl.BlockSpec((tb, n_pad, nl), lambda b: (b, 0, 0)),
        pl.BlockSpec((tb, n_pad, d), lambda b: (b, 0, 0)),
        pl.BlockSpec((d, jpad), lambda b: (0, 0), **w_kw),
        pl.BlockSpec((nl, jpad), lambda b: (0, 0), **w_kw),
        pl.BlockSpec((d, jpad), lambda b: (0, 0), **w_kw),
        pl.BlockSpec((1, jpad), lambda b: (0, 0), **w_kw),
    ]
    return pl.pallas_call(
        _relation_kernel,
        out_shape=jax.ShapeDtypeStruct((batch_pad, n_pad, jpad), jnp.float32),
        grid_spec=pltpu.PrefetchScalarGridSpec(
            num_scalar_prefetch=0,
            grid=(batch_pad // tb,),
            in_specs=in_specs,
            out_specs=pl.BlockSpec((tb, n_pad, jpad), lambda b: (b, 0, 0)),
        ),
        compiler_params=compiler_params,
    )


# --------------------------------------------------------------------------
# Forward pass
# --------------------------------------------------------------------------
def relation_encoder_apply(params, cxt_feats, cxt_lfeats, cxt_dif_feats, *,
                           target_rows=None):
    w1, w2, w3, b2 = params["w1"], params["w2"], params["w3"], params["b"]
    jemb_dim = params["jemb_dim"]
    compute_dtype = w1.dtype
    batch, num_cxt, fc7_dim = cxt_feats.shape
    nl = cxt_lfeats.shape[-1]
    jpad = w1.shape[-1]

    # Mask: trivial memory-bound reduce on the ORIGINAL (unpadded) lfeats,
    # kept outside the kernel (removes the lane-width-1 kernel output).
    masks = (jnp.sum(cxt_lfeats, axis=2) != 0).astype(jnp.float32)

    # Pad num_cxt to a sublane multiple (8) and batch to a TB multiple so the
    # kernel reshape is a free re-view and the MXU sees full tiles for any
    # batch / num_cxt. Zero rows normalize to zero and are sliced off below.
    n_pad = _round_up(num_cxt, 8)
    if target_rows is None:
        target_rows = _default_target_rows()
    tb = _pick_batch_tile(batch, n_pad, target_rows)
    batch_pad = _round_up(batch, tb)

    def pad_cast(x, dtype):
        x = x.astype(dtype)
        pb, pn = batch_pad - batch, n_pad - num_cxt
        if pb or pn:
            x = jnp.pad(x, ((0, pb), (0, pn), (0, 0)))
        return x

    # Feed activations in the compute dtype (bf16 by default): the kernel is
    # HBM-bound on activation reads at production shapes, so this halves the
    # dominant traffic. L2-norm + matmul accumulation stay f32 in-kernel.
    feats_p = pad_cast(cxt_feats, compute_dtype)
    dif_p = pad_cast(cxt_dif_feats, compute_dtype)
    lfeats_p = pad_cast(cxt_lfeats, jnp.float32)

    def comp_params(single_buffer_weights):
        need = _vmem_bytes(tb, n_pad, fc7_dim, nl, jpad,
                           jnp.dtype(compute_dtype).itemsize,
                           jnp.dtype(compute_dtype).itemsize,
                           single_buffer_weights)
        kwargs = dict(dimension_semantics=("parallel",))
        if need > (24 << 20):        # only raise the scoped limit when needed
            kwargs["vmem_limit_bytes"] = min(need + (16 << 20), 96 << 20)
        return pltpu.CompilerParams(**kwargs)

    args = (feats_p, lfeats_p, dif_p, w1, w2, w3, b2)
    try:
        rel_p = _build_call(batch_pad, n_pad, fc7_dim, nl, jpad, tb,
                            comp_params(True), True)(*args)
    except Exception:
        # Fallback for Pallas versions that reject Buffered(1) single-buffered
        # weight blocks: default double-buffering (correctness unaffected).
        rel_p = _build_call(batch_pad, n_pad, fc7_dim, nl, jpad, tb,
                            comp_params(False), False)(*args)

    rel = rel_p[:batch, :num_cxt, :jemb_dim]
    return rel, masks


def relation_encoder(cxt_feats, cxt_lfeats, cxt_dif_feats, weight, bias, *,
                     compute_dtype=jnp.bfloat16, target_rows=None):
    """Convenience one-shot wrapper. In production, call
    prepare_relation_weights() once and reuse the result (weight prep is pure
    HBM traffic and should not run per forward call)."""
    params = prepare_relation_weights(weight, bias, cxt_feats.shape[-1],
                                      compute_dtype=compute_dtype)
    return relation_encoder_apply(params, cxt_feats, cxt_lfeats, cxt_dif_feats,
                                  target_rows=target_rows)


# --------------------------------------------------------------------------
# Pure-JAX reference (mirrors the PyTorch module)
# --------------------------------------------------------------------------
def _reference(cxt_feats, cxt_lfeats, cxt_dif_feats, weight, bias):
    eps = 1e-12

    def norm_dim1(x):
        n = jnp.sqrt(jnp.sum(x * x, axis=1, keepdims=True))
        return x / jnp.maximum(n, eps)

    masks = (jnp.sum(cxt_lfeats, axis=2) != 0).astype(jnp.float32)
    b, n = cxt_feats.shape[0], cxt_feats.shape[1]
    a = norm_dim1(cxt_feats).reshape(b * n, -1)
    l = norm_dim1(cxt_lfeats).reshape(b * n, -1)
    d = norm_dim1(cxt_dif_feats).reshape(b * n, -1)
    concat = jnp.concatenate([a, l, d], axis=1)
    rel = (jnp.dot(concat, weight.T, precision=jax.lax.Precision.HIGHEST)
           + bias).reshape(b, n, -1)
    return rel, masks


if __name__ == "__main__":
    # Small shapes that exercise the padding paths: num_cxt=5 (MAttNet-style,
    # padded to 8), odd batch=3 (padded to a TB multiple, grid of 2),
    # jemb_dim=48 (output lane dim padded to 128 and sliced back).
    batch, num_cxt, fc7_dim, jemb_dim = 3, 5, 32, 48
    in_dim = fc7_dim * 2 + 5

    key = jax.random.PRNGKey(0)
    k1, k2, k3, k4, k5 = jax.random.split(key, 5)

    cxt_feats = jax.random.normal(k1, (batch, num_cxt, fc7_dim), jnp.float32)
    cxt_lfeats = jax.random.normal(k2, (batch, num_cxt, 5), jnp.float32)
    # zero out one context row so the mask exercises both branches
    cxt_lfeats = cxt_lfeats.at[0, 3, :].set(0.0)
    cxt_dif_feats = jax.random.normal(k3, (batch, num_cxt, fc7_dim), jnp.float32)

    # nn.Linear-style deterministic init: U(-1/sqrt(in), 1/sqrt(in))
    bound = 1.0 / (in_dim ** 0.5)
    weight = jax.random.uniform(k4, (jemb_dim, in_dim), jnp.float32, -bound, bound)
    bias = jax.random.uniform(k5, (jemb_dim,), jnp.float32, -bound, bound)

    rel_ref, masks_ref = _reference(cxt_feats, cxt_lfeats, cxt_dif_feats,
                                    weight, bias)

    # f32 compute path: tight check against the high-precision reference.
    params_f32 = prepare_relation_weights(weight, bias, fc7_dim,
                                          compute_dtype=jnp.float32)
    rel_f32, masks = relation_encoder_apply(params_f32, cxt_feats, cxt_lfeats,
                                            cxt_dif_feats)
    jax.block_until_ready((rel_f32, masks))
    assert rel_f32.shape == (batch, num_cxt, jemb_dim)
    assert masks.shape == (batch, num_cxt)
    assert jnp.allclose(rel_f32, rel_ref, rtol=1e-3, atol=1e-3)
    assert jnp.allclose(masks, masks_ref)

    # Default (bf16 MXU) path: looser tolerance — activations and the two big
    # weight chunks are rounded to bf16, accumulation stays f32.
    params_bf = prepare_relation_weights(weight, bias, fc7_dim)
    rel_bf, masks_bf = relation_encoder_apply(params_bf, cxt_feats, cxt_lfeats,
                                              cxt_dif_feats)
    jax.block_until_ready((rel_bf, masks_bf))
    assert jnp.allclose(rel_bf, rel_ref, rtol=3e-2, atol=3e-2)
    assert jnp.allclose(masks_bf, masks_ref)

    print("KERNEL_OK")
</pallas_src>

<mosaic_0001>
module attributes {stable_mosaic.version = 11 : i64} {
  func.func @_relation_kernel(%arg0: i32, %arg1: memref<2x8x32xf32, #tpu.memory_space<vmem>>, %arg2: memref<2x8x5xf32, #tpu.memory_space<vmem>>, %arg3: memref<2x8x32xf32, #tpu.memory_space<vmem>>, %arg4: memref<32x128xf32, #tpu.memory_space<vmem>>, %arg5: memref<5x128xf32, #tpu.memory_space<vmem>>, %arg6: memref<32x128xf32, #tpu.memory_space<vmem>>, %arg7: memref<1x128xf32, #tpu.memory_space<vmem>>, %arg8: memref<2x8x128xf32, #tpu.memory_space<vmem>>) attributes {dimension_semantics = [#tpu.dimension_semantics<parallel>], iteration_bounds = array<i64: 2>, scalar_prefetch = 0 : i64, scratch_operands = 0 : i64, tpu.core_type = #tpu.core_type<tc>, window_params = [{transform_indices = @transform_0, window_bounds = array<i64: 2, 8, 32>}, {transform_indices = @transform_1, window_bounds = array<i64: 2, 8, 5>}, {transform_indices = @transform_2, window_bounds = array<i64: 2, 8, 32>}, {pipeline_mode = #tpu.pipeline_mode<synchronous>, transform_indices = @transform_3, window_bounds = array<i64: 32, 128>}, {pipeline_mode = #tpu.pipeline_mode<synchronous>, transform_indices = @transform_4, window_bounds = array<i64: 5, 128>}, {pipeline_mode = #tpu.pipeline_mode<synchronous>, transform_indices = @transform_5, window_bounds = array<i64: 32, 128>}, {pipeline_mode = #tpu.pipeline_mode<synchronous>, transform_indices = @transform_6, window_bounds = array<i64: 1, 128>}, {transform_indices = @transform_7, window_bounds = array<i64: 2, 8, 128>}]} {
    %c0 = arith.constant 0 : index
    %c0_0 = arith.constant 0 : index
    %c0_1 = arith.constant 0 : index
    %0 = vector.load %arg1[%c0, %c0_0, %c0_1] : memref<2x8x32xf32, #tpu.memory_space<vmem>>, vector<2x8x32xf32>
    %1 = arith.mulf %0, %0 : vector<2x8x32xf32>
    %cst = arith.constant dense<0.000000e+00> : vector<2x32xf32>
    %2 = vector.multi_reduction <add>, %1, %cst [1] : vector<2x8x32xf32> to vector<2x32xf32>
    %3 = vector.shape_cast %2 : vector<2x32xf32> to vector<2x1x32xf32>
    %cst_2 = arith.constant 1.000000e-24 : f32
    %4 = vector.broadcast %cst_2 : f32 to vector<2x1x32xf32>
    %5 = arith.maximumf %3, %4 : vector<2x1x32xf32>
    %6 = math.rsqrt %5 : vector<2x1x32xf32>
    %7 = vector.broadcast %6 : vector<2x1x32xf32> to vector<2x8x32xf32>
    %8 = arith.mulf %0, %7 : vector<2x8x32xf32>
    %9 = vector.shape_cast %8 : vector<2x8x32xf32> to vector<16x32xf32>
    %c0_3 = arith.constant 0 : index
    %c0_4 = arith.constant 0 : index
    %c0_5 = arith.constant 0 : index
    %10 = vector.load %arg3[%c0_3, %c0_4, %c0_5] : memref<2x8x32xf32, #tpu.memory_space<vmem>>, vector<2x8x32xf32>
    %11 = arith.mulf %10, %10 : vector<2x8x32xf32>
    %cst_6 = arith.constant dense<0.000000e+00> : vector<2x32xf32>
    %12 = vector.multi_reduction <add>, %11, %cst_6 [1] : vector<2x8x32xf32> to vector<2x32xf32>
    %13 = vector.shape_cast %12 : vector<2x32xf32> to vector<2x1x32xf32>
    %cst_7 = arith.constant 1.000000e-24 : f32
    %14 = vector.broadcast %cst_7 : f32 to vector<2x1x32xf32>
    %15 = arith.maximumf %13, %14 : vector<2x1x32xf32>
    %16 = math.rsqrt %15 : vector<2x1x32xf32>
    %17 = vector.broadcast %16 : vector<2x1x32xf32> to vector<2x8x32xf32>
    %18 = arith.mulf %10, %17 : vector<2x8x32xf32>
    %19 = vector.shape_cast %18 : vector<2x8x32xf32> to vector<16x32xf32>
    %c0_8 = arith.constant 0 : index
    %c0_9 = arith.constant 0 : index
    %c0_10 = arith.constant 0 : index
    %20 = vector.load %arg2[%c0_8, %c0_9, %c0_10] : memref<2x8x5xf32, #tpu.memory_space<vmem>>, vector<2x8x5xf32>
    %21 = arith.mulf %20, %20 : vector<2x8x5xf32>
    %cst_11 = arith.constant dense<0.000000e+00> : vector<2x5xf32>
    %22 = vector.multi_reduction <add>, %21, %cst_11 [1] : vector<2x8x5xf32> to vector<2x5xf32>
    %23 = vector.shape_cast %22 : vector<2x5xf32> to vector<2x1x5xf32>
    %cst_12 = arith.constant 1.000000e-24 : f32
    %24 = vector.broadcast %cst_12 : f32 to vector<2x1x5xf32>
    %25 = arith.maximumf %23, %24 : vector<2x1x5xf32>
    %26 = math.rsqrt %25 : vector<2x1x5xf32>
    %27 = vector.broadcast %26 : vector<2x1x5xf32> to vector<2x8x5xf32>
    %28 = arith.mulf %20, %27 : vector<2x8x5xf32>
    %29 = vector.shape_cast %28 : vector<2x8x5xf32> to vector<16x5xf32>
    %c0_13 = arith.constant 0 : index
    %c0_14 = arith.constant 0 : index
    %30 = vector.load %arg4[%c0_13, %c0_14] : memref<32x128xf32, #tpu.memory_space<vmem>>, vector<32x128xf32>
    %cst_15 = arith.constant dense<0.000000e+00> : vector<16x128xf32>
    %31 = tpu.matmul %9, %30, %cst_15 {dimension_numbers = #tpu.dot_dimension_numbers<[1], [0], [0], [1], [0, 0, 1, 1], [], []>} : vector<16x32xf32>, vector<32x128xf32>, vector<16x128xf32> -> vector<16x128xf32>
    %c0_16 = arith.constant 0 : index
    %c0_17 = arith.constant 0 : index
    %32 = vector.load %arg6[%c0_16, %c0_17] : memref<32x128xf32, #tpu.memory_space<vmem>>, vector<32x128xf32>
    %cst_18 = arith.constant dense<0.000000e+00> : vector<16x128xf32>
    %33 = tpu.matmul %19, %32, %cst_18 {dimension_numbers = #tpu.dot_dimension_numbers<[1], [0], [0], [1], [0, 0, 1, 1], [], []>} : vector<16x32xf32>, vector<32x128xf32>, vector<16x128xf32> -> vector<16x128xf32>
    %34 = arith.addf %31, %33 : vector<16x128xf32>
    %c0_19 = arith.constant 0 : index
    %c0_20 = arith.constant 0 : index
    %35 = vector.load %arg5[%c0_19, %c0_20] : memref<5x128xf32, #tpu.memory_space<vmem>>, vector<5x128xf32>
    %36 = vector.extract_strided_slice %29 {offsets = [0, 0], sizes = [16, 1], strides = [1, 1]} : vector<16x5xf32> to vector<16x1xf32>
    %37 = vector.extract_strided_slice %35 {offsets = [0, 0], sizes = [1, 128], strides = [1, 1]} : vector<5x128xf32> to vector<1x128xf32>
    %38 = vector.broadcast %36 : vector<16x1xf32> to vector<16x128xf32>
    %39 = vector.broadcast %37 : vector<1x128xf32> to vector<16x128xf32>
    %40 = arith.mulf %38, %39 : vector<16x128xf32>
    %41 = arith.addf %34, %40 : vector<16x128xf32>
    %42 = vector.extract_strided_slice %29 {offsets = [0, 1], sizes = [16, 1], strides = [1, 1]} : vector<16x5xf32> to vector<16x1xf32>
    %43 = vector.extract_strided_slice %35 {offsets = [1, 0], sizes = [1, 128], strides = [1, 1]} : vector<5x128xf32> to vector<1x128xf32>
    %44 = vector.broadcast %42 : vector<16x1xf32> to vector<16x128xf32>
    %45 = vector.broadcast %43 : vector<1x128xf32> to vector<16x128xf32>
    %46 = arith.mulf %44, %45 : vector<16x128xf32>
    %47 = arith.addf %41, %46 : vector<16x128xf32>
    %48 = vector.extract_strided_slice %29 {offsets = [0, 2], sizes = [16, 1], strides = [1, 1]} : vector<16x5xf32> to vector<16x1xf32>
    %49 = vector.extract_strided_slice %35 {offsets = [2, 0], sizes = [1, 128], strides = [1, 1]} : vector<5x128xf32> to vector<1x128xf32>
    %50 = vector.broadcast %48 : vector<16x1xf32> to vector<16x128xf32>
    %51 = vector.broadcast %49 : vector<1x128xf32> to vector<16x128xf32>
    %52 = arith.mulf %50, %51 : vector<16x128xf32>
    %53 = arith.addf %47, %52 : vector<16x128xf32>
    %54 = vector.extract_strided_slice %29 {offsets = [0, 3], sizes = [16, 1], strides = [1, 1]} : vector<16x5xf32> to vector<16x1xf32>
    %55 = vector.extract_strided_slice %35 {offsets = [3, 0], sizes = [1, 128], strides = [1, 1]} : vector<5x128xf32> to vector<1x128xf32>
    %56 = vector.broadcast %54 : vector<16x1xf32> to vector<16x128xf32>
    %57 = vector.broadcast %55 : vector<1x128xf32> to vector<16x128xf32>
    %58 = arith.mulf %56, %57 : vector<16x128xf32>
    %59 = arith.addf %53, %58 : vector<16x128xf32>
    %60 = vector.extract_strided_slice %29 {offsets = [0, 4], sizes = [16, 1], strides = [1, 1]} : vector<16x5xf32> to vector<16x1xf32>
    %61 = vector.extract_strided_slice %35 {offsets = [4, 0], sizes = [1, 128], strides = [1, 1]} : vector<5x128xf32> to vector<1x128xf32>
    %62 = vector.broadcast %60 : vector<16x1xf32> to vector<16x128xf32>
    %63 = vector.broadcast %61 : vector<1x128xf32> to vector<16x128xf32>
    %64 = arith.mulf %62, %63 : vector<16x128xf32>
    %65 = arith.addf %59, %64 : vector<16x128xf32>
    %c0_21 = arith.constant 0 : index
    %c0_22 = arith.constant 0 : index
    %66 = vector.load %arg7[%c0_21, %c0_22] : memref<1x128xf32, #tpu.memory_space<vmem>>, vector<1x128xf32>
    %67 = vector.broadcast %66 : vector<1x128xf32> to vector<16x128xf32>
    %68 = arith.addf %65, %67 : vector<16x128xf32>
    %69 = vector.shape_cast %68 : vector<16x128xf32> to vector<2x8x128xf32>
    %c0_23 = arith.constant 0 : index
    %c0_24 = arith.constant 0 : index
    %c0_25 = arith.constant 0 : index
    %70 = vector.load %arg8[%c0_23, %c0_24, %c0_25] : memref<2x8x128xf32, #tpu.memory_space<vmem>>, vector<2x8x128xf32>
    tpu.vector_store %arg8[%c0_23, %c0_24, %c0_25], %69 {strides = array<i32>} : memref<2x8x128xf32, #tpu.memory_space<vmem>>, vector<2x8x128xf32>,
    return
  }
  func.func @transform_0(%arg0: i32) -> (i32, i32, i32) {
    %c0_i32 = arith.constant 0 : i32
    %c0_i32_0 = arith.constant 0 : i32
    %c0_i32_1 = arith.constant 0 : i32
    return %arg0, %c0_i32, %c0_i32_0 : i32, i32, i32
  }
  func.func @transform_1(%arg0: i32) -> (i32, i32, i32) {
    %c0_i32 = arith.constant 0 : i32
    %c0_i32_0 = arith.constant 0 : i32
    %c0_i32_1 = arith.constant 0 : i32
    return %arg0, %c0_i32, %c0_i32_0 : i32, i32, i32
  }
  func.func @transform_2(%arg0: i32) -> (i32, i32, i32) {
    %c0_i32 = arith.constant 0 : i32
    %c0_i32_0 = arith.constant 0 : i32
    %c0_i32_1 = arith.constant 0 : i32
    return %arg0, %c0_i32, %c0_i32_0 : i32, i32, i32
  }
  func.func @transform_3(%arg0: i32) -> (i32, i32) {
    %c0_i32 = arith.constant 0 : i32
    %c0_i32_0 = arith.constant 0 : i32
    %c0_i32_1 = arith.constant 0 : i32
    return %c0_i32, %c0_i32_0 : i32, i32
  }
  func.func @transform_4(%arg0: i32) -> (i32, i32) {
    %c0_i32 = arith.constant 0 : i32
    %c0_i32_0 = arith.constant 0 : i32
    %c0_i32_1 = arith.constant 0 : i32
    return %c0_i32, %c0_i32_0 : i32, i32
  }
  func.func @transform_5(%arg0: i32) -> (i32, i32) {
    %c0_i32 = arith.constant 0 : i32
    %c0_i32_0 = arith.constant 0 : i32
    %c0_i32_1 = arith.constant 0 : i32
    return %c0_i32, %c0_i32_0 : i32, i32
  }
  func.func @transform_6(%arg0: i32) -> (i32, i32) {
    %c0_i32 = arith.constant 0 : i32
    %c0_i32_0 = arith.constant 0 : i32
    %c0_i32_1 = arith.constant 0 : i32
    return %c0_i32, %c0_i32_0 : i32, i32
  }
  func.func @transform_7(%arg0: i32) -> (i32, i32, i32) {
    %c0_i32 = arith.constant 0 : i32
    %c0_i32_0 = arith.constant 0 : i32
    %c0_i32_1 = arith.constant 0 : i32
    return %arg0, %c0_i32, %c0_i32_0 : i32, i32, i32
  }
}

module attributes {stable_mosaic.version = 11 : i64} {
  func.func @_relation_kernel(%arg0: i32, %arg1: memref<2x8x32xf32, #tpu.memory_space<vmem>>, %arg2: memref<2x8x5xf32, #tpu.memory_space<vmem>>, %arg3: memref<2x8x32xf32, #tpu.memory_space<vmem>>, %arg4: memref<32x128xf32, #tpu.memory_space<vmem>>, %arg5: memref<5x128xf32, #tpu.memory_space<vmem>>, %arg6: memref<32x128xf32, #tpu.memory_space<vmem>>, %arg7: memref<1x128xf32, #tpu.memory_space<vmem>>, %arg8: memref<2x8x128xf32, #tpu.memory_space<vmem>>) attributes {dimension_semantics = [#tpu.dimension_semantics<parallel>], iteration_bounds = array<i64: 2>, scalar_prefetch = 0 : i64, scratch_operands = 0 : i64, tpu.core_type = #tpu.core_type<tc>, window_params = [{transform_indices = @transform_0, window_bounds = array<i64: 2, 8, 32>}, {transform_indices = @transform_1, window_bounds = array<i64: 2, 8, 5>}, {transform_indices = @transform_2, window_bounds = array<i64: 2, 8, 32>}, {pipeline_mode = #tpu.pipeline_mode<synchronous>, transform_indices = @transform_3, window_bounds = array<i64: 32, 128>}, {pipeline_mode = #tpu.pipeline_mode<synchronous>, transform_indices = @transform_4, window_bounds = array<i64: 5, 128>}, {pipeline_mode = #tpu.pipeline_mode<synchronous>, transform_indices = @transform_5, window_bounds = array<i64: 32, 128>}, {pipeline_mode = #tpu.pipeline_mode<synchronous>, transform_indices = @transform_6, window_bounds = array<i64: 1, 128>}, {transform_indices = @transform_7, window_bounds = array<i64: 2, 8, 128>}]} {
    %c0 = arith.constant 0 : index
    %c0_0 = arith.constant 0 : index
    %c0_1 = arith.constant 0 : index
    %0 = vector.load %arg1[%c0, %c0_0, %c0_1] : memref<2x8x32xf32, #tpu.memory_space<vmem>>, vector<2x8x32xf32>
    %1 = arith.mulf %0, %0 : vector<2x8x32xf32>
    %cst = arith.constant dense<0.000000e+00> : vector<2x32xf32>
    %2 = vector.multi_reduction <add>, %1, %cst [1] : vector<2x8x32xf32> to vector<2x32xf32>
    %3 = vector.shape_cast %2 : vector<2x32xf32> to vector<2x1x32xf32>
    %cst_2 = arith.constant 1.000000e-24 : f32
    %4 = vector.broadcast %cst_2 : f32 to vector<2x1x32xf32>
    %5 = arith.maximumf %3, %4 : vector<2x1x32xf32>
    %6 = math.rsqrt %5 : vector<2x1x32xf32>
    %7 = vector.broadcast %6 : vector<2x1x32xf32> to vector<2x8x32xf32>
    %8 = arith.mulf %0, %7 : vector<2x8x32xf32>
    %9 = vector.shape_cast %8 : vector<2x8x32xf32> to vector<16x32xf32>
    %c0_3 = arith.constant 0 : index
    %c0_4 = arith.constant 0 : index
    %c0_5 = arith.constant 0 : index
    %10 = vector.load %arg3[%c0_3, %c0_4, %c0_5] : memref<2x8x32xf32, #tpu.memory_space<vmem>>, vector<2x8x32xf32>
    %11 = arith.mulf %10, %10 : vector<2x8x32xf32>
    %cst_6 = arith.constant dense<0.000000e+00> : vector<2x32xf32>
    %12 = vector.multi_reduction <add>, %11, %cst_6 [1] : vector<2x8x32xf32> to vector<2x32xf32>
    %13 = vector.shape_cast %12 : vector<2x32xf32> to vector<2x1x32xf32>
    %cst_7 = arith.constant 1.000000e-24 : f32
    %14 = vector.broadcast %cst_7 : f32 to vector<2x1x32xf32>
    %15 = arith.maximumf %13, %14 : vector<2x1x32xf32>
    %16 = math.rsqrt %15 : vector<2x1x32xf32>
    %17 = vector.broadcast %16 : vector<2x1x32xf32> to vector<2x8x32xf32>
    %18 = arith.mulf %10, %17 : vector<2x8x32xf32>
    %19 = vector.shape_cast %18 : vector<2x8x32xf32> to vector<16x32xf32>
    %c0_8 = arith.constant 0 : index
    %c0_9 = arith.constant 0 : index
    %c0_10 = arith.constant 0 : index
    %20 = vector.load %arg2[%c0_8, %c0_9, %c0_10] : memref<2x8x5xf32, #tpu.memory_space<vmem>>, vector<2x8x5xf32>
    %21 = arith.mulf %20, %20 : vector<2x8x5xf32>
    %cst_11 = arith.constant dense<0.000000e+00> : vector<2x5xf32>
    %22 = vector.multi_reduction <add>, %21, %cst_11 [1] : vector<2x8x5xf32> to vector<2x5xf32>
    %23 = vector.shape_cast %22 : vector<2x5xf32> to vector<2x1x5xf32>
    %cst_12 = arith.constant 1.000000e-24 : f32
    %24 = vector.broadcast %cst_12 : f32 to vector<2x1x5xf32>
    %25 = arith.maximumf %23, %24 : vector<2x1x5xf32>
    %26 = math.rsqrt %25 : vector<2x1x5xf32>
    %27 = vector.broadcast %26 : vector<2x1x5xf32> to vector<2x8x5xf32>
    %28 = arith.mulf %20, %27 : vector<2x8x5xf32>
    %29 = vector.shape_cast %28 : vector<2x8x5xf32> to vector<16x5xf32>
    %c0_13 = arith.constant 0 : index
    %c0_14 = arith.constant 0 : index
    %30 = vector.load %arg4[%c0_13, %c0_14] : memref<32x128xf32, #tpu.memory_space<vmem>>, vector<32x128xf32>
    %cst_15 = arith.constant dense<0.000000e+00> : vector<16x128xf32>
    %31 = tpu.matmul %9, %30, %cst_15 {dimension_numbers = #tpu.dot_dimension_numbers<[1], [0], [0], [1], [0, 0, 1, 1], [], []>} : vector<16x32xf32>, vector<32x128xf32>, vector<16x128xf32> -> vector<16x128xf32>
    %c0_16 = arith.constant 0 : index
    %c0_17 = arith.constant 0 : index
    %32 = vector.load %arg6[%c0_16, %c0_17] : memref<32x128xf32, #tpu.memory_space<vmem>>, vector<32x128xf32>
    %cst_18 = arith.constant dense<0.000000e+00> : vector<16x128xf32>
    %33 = tpu.matmul %19, %32, %cst_18 {dimension_numbers = #tpu.dot_dimension_numbers<[1], [0], [0], [1], [0, 0, 1, 1], [], []>} : vector<16x32xf32>, vector<32x128xf32>, vector<16x128xf32> -> vector<16x128xf32>
    %34 = arith.addf %31, %33 : vector<16x128xf32>
    %c0_19 = arith.constant 0 : index
    %c0_20 = arith.constant 0 : index
    %35 = vector.load %arg5[%c0_19, %c0_20] : memref<5x128xf32, #tpu.memory_space<vmem>>, vector<5x128xf32>
    %36 = vector.extract_strided_slice %29 {offsets = [0, 0], sizes = [16, 1], strides = [1, 1]} : vector<16x5xf32> to vector<16x1xf32>
    %37 = vector.extract_strided_slice %35 {offsets = [0, 0], sizes = [1, 128], strides = [1, 1]} : vector<5x128xf32> to vector<1x128xf32>
    %38 = vector.broadcast %36 : vector<16x1xf32> to vector<16x128xf32>
    %39 = vector.broadcast %37 : vector<1x128xf32> to vector<16x128xf32>
    %40 = arith.mulf %38, %39 : vector<16x128xf32>
    %41 = arith.addf %34, %40 : vector<16x128xf32>
    %42 = vector.extract_strided_slice %29 {offsets = [0, 1], sizes = [16, 1], strides = [1, 1]} : vector<16x5xf32> to vector<16x1xf32>
    %43 = vector.extract_strided_slice %35 {offsets = [1, 0], sizes = [1, 128], strides = [1, 1]} : vector<5x128xf32> to vector<1x128xf32>
    %44 = vector.broadcast %42 : vector<16x1xf32> to vector<16x128xf32>
    %45 = vector.broadcast %43 : vector<1x128xf32> to vector<16x128xf32>
    %46 = arith.mulf %44, %45 : vector<16x128xf32>
    %47 = arith.addf %41, %46 : vector<16x128xf32>
    %48 = vector.extract_strided_slice %29 {offsets = [0, 2], sizes = [16, 1], strides = [1, 1]} : vector<16x5xf32> to vector<16x1xf32>
    %49 = vector.extract_strided_slice %35 {offsets = [2, 0], sizes = [1, 128], strides = [1, 1]} : vector<5x128xf32> to vector<1x128xf32>
    %50 = vector.broadcast %48 : vector<16x1xf32> to vector<16x128xf32>
    %51 = vector.broadcast %49 : vector<1x128xf32> to vector<16x128xf32>
    %52 = arith.mulf %50, %51 : vector<16x128xf32>
    %53 = arith.addf %47, %52 : vector<16x128xf32>
    %54 = vector.extract_strided_slice %29 {offsets = [0, 3], sizes = [16, 1], strides = [1, 1]} : vector<16x5xf32> to vector<16x1xf32>
    %55 = vector.extract_strided_slice %35 {offsets = [3, 0], sizes = [1, 128], strides = [1, 1]} : vector<5x128xf32> to vector<1x128xf32>
    %56 = vector.broadcast %54 : vector<16x1xf32> to vector<16x128xf32>
    %57 = vector.broadcast %55 : vector<1x128xf32> to vector<16x128xf32>
    %58 = arith.mulf %56, %57 : vector<16x128xf32>
    %59 = arith.addf %53, %58 : vector<16x128xf32>
    %60 = vector.extract_strided_slice %29 {offsets = [0, 4], sizes = [16, 1], strides = [1, 1]} : vector<16x5xf32> to vector<16x1xf32>
    %61 = vector.extract_strided_slice %35 {offsets = [4, 0], sizes = [1, 128], strides = [1, 1]} : vector<5x128xf32> to vector<1x128xf32>
    %62 = vector.broadcast %60 : vector<16x1xf32> to vector<16x128xf32>
    %63 = vector.broadcast %61 : vector<1x128xf32> to vector<16x128xf32>
    %64 = arith.mulf %62, %63 : vector<16x128xf32>
    %65 = arith.addf %59, %64 : vector<16x128xf32>
    %c0_21 = arith.constant 0 : index
    %c0_22 = arith.constant 0 : index
    %66 = vector.load %arg7[%c0_21, %c0_22] : memref<1x128xf32, #tpu.memory_space<vmem>>, vector<1x128xf32>
    %67 = vector.broadcast %66 : vector<1x128xf32> to vector<16x128xf32>
    %68 = arith.addf %65, %67 : vector<16x128xf32>
    %69 = vector.shape_cast %68 : vector<16x128xf32> to vector<2x8x128xf32>
    %c0_23 = arith.constant 0 : index
    %c0_24 = arith.constant 0 : index
    %c0_25 = arith.constant 0 : index
    %70 = vector.load %arg8[%c0_23, %c0_24, %c0_25] : memref<2x8x128xf32, #tpu.memory_space<vmem>>, vector<2x8x128xf32>
    tpu.vector_store %arg8[%c0_23, %c0_24, %c0_25], %69 {strides = array<i32>} : memref<2x8x128xf32, #tpu.memory_space<vmem>>, vector<2x8x128xf32>,
    return
  }
  func.func @transform_0(%arg0: i32) -> (i32, i32, i32) {
    %c0_i32 = arith.constant 0 : i32
    %c0_i32_0 = arith.constant 0 : i32
    %c0_i32_1 = arith.constant 0 : i32
    return %arg0, %c0_i32, %c0_i32_0 : i32, i32, i32
  }
  func.func @transform_1(%arg0: i32) -> (i32, i32, i32) {
    %c0_i32 = arith.constant 0 : i32
    %c0_i32_0 = arith.constant 0 : i32
    %c0_i32_1 = arith.constant 0 : i32
    return %arg0, %c0_i32, %c0_i32_0 : i32, i32, i32
  }
  func.func @transform_2(%arg0: i32) -> (i32, i32, i32) {
    %c0_i32 = arith.constant 0 : i32
    %c0_i32_0 = arith.constant 0 : i32
    %c0_i32_1 = arith.constant 0 : i32
    return %arg0, %c0_i32, %c0_i32_0 : i32, i32, i32
  }
  func.func @transform_3(%arg0: i32) -> (i32, i32) {
    %c0_i32 = arith.constant 0 : i32
    %c0_i32_0 = arith.constant 0 : i32
    %c0_i32_1 = arith.constant 0 : i32
    return %c0_i32, %c0_i32_0 : i32, i32
  }
  func.func @transform_4(%arg0: i32) -> (i32, i32) {
    %c0_i32 = arith.constant 0 : i32
    %c0_i32_0 = arith.constant 0 : i32
    %c0_i32_1 = arith.constant 0 : i32
    return %c0_i32, %c0_i32_0 : i32, i32
  }
  func.func @transform_5(%arg0: i32) -> (i32, i32) {
    %c0_i32 = arith.constant 0 : i32
    %c0_i32_0 = arith.constant 0 : i32
    %c0_i32_1 = arith.constant 0 : i32
    return %c0_i32, %c0_i32_0 : i32, i32
  }
  func.func @transform_6(%arg0: i32) -> (i32, i32) {
    %c0_i32 = arith.constant 0 : i32
    %c0_i32_0 = arith.constant 0 : i32
    %c0_i32_1 = arith.constant 0 : i32
    return %c0_i32, %c0_i32_0 : i32, i32
  }
  func.func @transform_7(%arg0: i32) -> (i32, i32, i32) {
    %c0_i32 = arith.constant 0 : i32
    %c0_i32_0 = arith.constant 0 : i32
    %c0_i32_1 = arith.constant 0 : i32
    return %arg0, %c0_i32, %c0_i32_0 : i32, i32, i32
  }
}

</mosaic_0001>

<bundles_post_ra>
// kernel: tpu_custom_call.1
= control target key start
LH: loop header
LB: loop body
LE: loop exit
PB: predicated region body
PF: predicated region fallthrough
CT: control target
= control target key end

     0   :  { %s1536_s0 = inlined_call_operand.vmem [shape: f32[4,8,32], index: 0, kind: input, shape index: {}]   ;;  %s1537_s1 = inlined_call_operand.vmem [shape: f32[4,8,5], index: 1, kind: input, shape index: {}]   ;;  %s1538_s2 = inlined_call_operand.hbm [shape: f32[4,8,32], index: 2, kind: input, shape index: {}]   ;;  %s1539_s3 = inlined_call_operand.hbm [shape: f32[32,128], index: 3, kind: input, shape index: {}]   ;;  %s1540_s4 = inlined_call_operand.hbm [shape: f32[5,128], index: 4, kind: input, shape index: {}]   ;;  %s1541_s5 = inlined_call_operand.vmem [shape: f32[32,128], index: 5, kind: input, shape index: {}]   ;;  %s1542_s6 = inlined_call_operand.vmem [shape: f32[1,128], index: 6, kind: input, shape index: {}]   ;;  %s1543_s7 = inlined_call_operand.hbm [shape: f32[4,8,128], index: 7, kind: output, shape index: {}]  }
   0x1   :  { %1549 = sst [smem:[#allocation12_spill]] %s1538_s2 }
   0x2   :  { %12 = vsyncpa [#allocation3], 0 }
   0x3   :  { %14 = vsyncpa [#allocation3 + $0x1], 0 }
   0x4   :  { %15 = vsyncpa [#allocation6], 0 }
   0x5   :  { %16 = vsyncpa [#allocation4], 0 }
   0x6   :  { %18 = vsyncpa [#allocation4 + $0x1], 0  ;;  %s1226_s24 = smov 0   ;;  %s1228_s25 = smov 0  }
   0x7   :  { %s1230_s26 = smov 0   ;;  %s1232_s27 = smov 0  }
   0x8 LB: > { %s1247_s28 = sadd.s32 4294967295, %s1171_s27   ;;  %s838_s29 = sadd.s32 4294967294, %s1171_s27   ;;  %s1171_s27 = sphi %s1232_s27, %s1569_s27   ;;  %s1167_s26 = sphi %s1230_s26, %s1568_s26   ;;  %s1163_s25 = sphi %s1228_s25, %s1567_s25   ;;  %s1159_s24 = sphi %s1226_s24, %s1566_s24  }
   0x9   : > { %p96_p0 = scmp.ne.s32.totalorder %s1163_s25, %s1159_s24  ;;  %p1544_p1 = scmp.eq.s32.totalorder %s1247_s28, 0 }
   0xa   : > { %p210_p3 = scmp.eq.s32.totalorder %s838_s29, 1  ;;  %p839_p5 = scmp.ge.s32.totalorder %s1171_s27, 1 }
   0xb   : > { %p1256_p4 = por %p1544_p1, %p96_p0  ;;  %p217_p7 = scmp.lt.s32.totalorder %s1171_s27, 3 }
   0xc   : > { %p1261_p6 = por %p210_p3, %p96_p0  ;;  %s1173_s10 = smov [#allocation5]  }
   0xd   : > { %s1550_s30 = scalar_select %p1256_p4, 1, 0 }
   0xe   : > { %s1551_s8 = scalar_select %p1261_p6, 1, 0 }
   0xf   : > { %p1266_p8 = pnand %p839_p5, %p217_p7  ;;  %s229_s11 = sshll.u32 %s1173_s10, 4  ;;  %s1270_s11 = int_to_ptr.vmem [resolvable:$true] %s229_s11 }
  0x10   : > { %s1174_s13 = smov [#allocation7]   ;;  %s1015_s17 = scalar_lea.hbm %s1539_s3, 512 }
  0x11   : > { %p931_p9 = pneg %p1266_p8  ;;  %s243_s14 = sshll.u32 %s1174_s13, 4  ;;  %s1281_s14 = int_to_ptr.vmem [resolvable:$true] %s243_s14 }
  0x12   : > { %p1016_p12 = scmp.ne.s32.totalorder %s1539_s3, %s1015_s17  ;;  %p1022_p5 = scmp.lt.u32.totalorder %s1015_s17, %s1539_s3 }
  0x13   : > { %p1277_p11 = pnand %p931_p9, %p1544_p1 }
  0x15   : > { %p1017_p13 = pneg %p1277_p11 }
  0x17   : > { %p1018_p0 = pnand %p1017_p13, %p1016_p12 }
  0x19   : > { %p1019_p3 = pneg %p1018_p0 }
  0x1b   : > { %p1024_p7 = pnand %p1022_p5, %p1019_p3 }
  0x1d   : > { %1027 = shalt.err (!%p1024_p7)
}
  0x1e   : > { %s1028_s22 = scalar_lea.vmem %s1270_s11, 512  ;;  %p1036_p2 = scmp.lt.s32.totalorder %s1270_s11, %s1270_s11 }
  0x1f   : > { %p1029_p9 = scmp.ne.s32.totalorder %s1270_s11, %s1028_s22  ;;  %p1037_p12 = scmp.lt.s32.totalorder %s1028_s22, %s1028_s22 }
  0x21   : > { %p1031_p10 = pnand %p1029_p9, %p1017_p13  ;;  %p1038_p0 = por %p1037_p12, %p1036_p2 }
  0x23   : > { %p1032_p1 = pneg %p1031_p10 }
  0x25   : > { %p1039_p6 = pnand %p1038_p0, %p1032_p1 }
  0x27   : > { %1042 = shalt.err (!%p1039_p6)
}
  0x28   : > { %s1545_s23 = smov 128   ;;  %s1176_s29 = smov 8  }
  0x29   : > { %934 = dma.hbm_to_vmem [thread:$0]  (!%p1277_p11), %s1539_s3, 512, %s1270_s11, [#allocation6], %s1545_s23, %s1545_s23, %s1176_s29  }
  0x2a   : > { %s1043_s17 = scalar_lea.hbm %s1540_s4, 128 }
  0x2b   : > { %p1044_p1 = scmp.ne.s32.totalorder %s1540_s4, %s1043_s17  ;;  %p1050_p10 = scmp.lt.u32.totalorder %s1043_s17, %s1540_s4 }
  0x2d   : > { %p1046_p2 = pnand %p1044_p1, %p1017_p13 }
  0x2f   : > { %p1047_p6 = pneg %p1046_p2 }
  0x31   : > { %p1052_p3 = pnand %p1050_p10, %p1047_p6 }
  0x33   : > { %1055 = shalt.err (!%p1052_p3)
}
  0x34   : > { %s1056_s11 = scalar_lea.vmem %s1281_s14, 128  ;;  %p1064_p12 = scmp.lt.s32.totalorder %s1281_s14, %s1281_s14 }
  0x35   : > { %p1057_p5 = scmp.ne.s32.totalorder %s1281_s14, %s1056_s11  ;;  %p1065_p0 = scmp.lt.s32.totalorder %s1056_s11, %s1056_s11 }
  0x37   : > { %p1059_p7 = pnand %p1057_p5, %p1017_p13  ;;  %p1066_p1 = por %p1065_p0, %p1064_p12 }
  0x39   : > { %p1060_p9 = pneg %p1059_p7 }
  0x3b   : > { %p1067_p2 = pnand %p1066_p1, %p1060_p9 }
  0x3d   : > { %1070 = shalt.err (!%p1067_p2)
}
  0x3e   : > { %937 = dma.hbm_to_vmem [thread:$0]  (!%p1277_p11), %s1540_s4, 128, %s1281_s14, [#allocation6]  }
  0x3f   : > { %s1339_s13 = sadd.s32 1, %s1171_s27   ;;  %s83_s12 = sadd.s32 1, %s1167_s26 }
  0x40   : > { %s80_s15 = ssub.s32 %s1171_s27, %s1339_s13  ;;  %p90_p13 = scmp.ne.s32.totalorder %s1167_s26, %s1163_s25 }
  0x41   : > { %p81_p6 = scmp.eq.s32.totalorder %s80_s15, 0  ;;  %p91_p10 = scmp.eq.s32.totalorder %s1171_s27, 0 }
  0x42   : > { %p1554_p3 = scmp.eq.s32.totalorder %s1247_s28, 1  ;;  %p948_p7 = scmp.lt.s32.totalorder %s1171_s27, 2 }
  0x43   : > { %s1355_s17 = scalar_select %p81_p6, %s1167_s26, %s83_s12  }
  0x44   : > { %p1349_p5 = por %p1554_p3, %p90_p13  ;;  %p92_p9 = por %p91_p10, %p90_p13 }
  0x45   : > { %s278_s18 = sand.u32 1, %s1167_s26   ;;  %s865_s14 = sshll.u32 %s1171_s27, 8 }
  0x46   : > { %s1555_s16 = scalar_select %p1349_p5, 1, 0 }
  0x47   : > { %s843_s19 = sshll.u32 %s278_s18, 4  ;;  %s1556_s2 = sld [smem:[#allocation12_spill]] }
  0x48   : > { %s282_s22 = scalar_lea.vmem [#allocation2], %s843_s19  ;;  %p1366_p11 = pnand %p948_p7, %p92_p9 }
  0x49   : > { %s289_s10 = sshll.u32 %s282_s22, 4  ;;  %s1370_s15 = scalar_lea.sflag [#allocation3], %s278_s18  ;;  %s1364_s10 = int_to_ptr.vmem [resolvable:$true] %s289_s10 }
  0x4a   : > { %p1073_p0 = pneg %p1366_p11 }
  0x4d   : > { %s1362_s11 = scalar_lea.hbm %s1556_s2, %s865_s14  ;;  %s1076_s20 = scalar_lea.hbm %s1556_s2, 512 }
  0x4e   : > { %s1071_s23 = scalar_lea.hbm %s1362_s11, 256  ;;  %p1077_p13 = scmp.lt.u32.totalorder %s1362_s11, %s1556_s2 }
  0x4f   : > { %p1072_p12 = scmp.ne.s32.totalorder %s1362_s11, %s1071_s23  ;;  %p1078_p6 = scmp.lt.u32.totalorder %s1076_s20, %s1071_s23 }
  0x50   : > { %p1080_p3 = scmp.lt.u32.totalorder %s1071_s23, %s1362_s11 }
  0x51   : > { %p1074_p1 = pnand %p1073_p0, %p1072_p12  ;;  %p1079_p10 = por %p1078_p6, %p1077_p13 }
  0x53   : > { %p1075_p2 = pneg %p1074_p1  ;;  %p1081_p7 = por %p1080_p3, %p1079_p10 }
  0x55   : > { %p1082_p9 = pnand %p1081_p7, %p1075_p2 }
  0x57   : > { %1085 = shalt.err (!%p1082_p9)
}
  0x58   : > { %s1086_s18 = scalar_lea.vmem %s1364_s10, 256  ;;  %s1177_s19 = smov [#allocation2]  }
  0x59   : > { %p1087_p12 = scmp.ne.s32.totalorder %s1364_s10, %s1086_s18  ;;  %s1091_s14 = sshll.u32 %s1177_s19, 4  ;;  %s1092_s14 = int_to_ptr.vmem [resolvable:$false] %s1091_s14 }
  0x5a   : > { %s1093_s21 = scalar_lea.vmem %s1092_s14, 512  ;;  %p1094_p4 = scmp.lt.s32.totalorder %s1364_s10, %s1092_s14 }
  0x5b   : > { %p1089_p1 = pnand %p1087_p12, %p1073_p0  ;;  %p1095_p13 = scmp.lt.s32.totalorder %s1093_s21, %s1086_s18 }
  0x5d   : > { %p1090_p5 = pneg %p1089_p1  ;;  %p1096_p6 = por %p1095_p13, %p1094_p4 }
  0x5f   : > { %p1097_p10 = pnand %p1096_p6, %p1090_p5 }
  0x61   : > { %1100 = shalt.err (!%p1097_p10)
}
  0x62   : > { %s1558_s23 = smov 128   ;;  %301 = sbr.rel (%p1266_p8) target bundleno = 392 (0x188), region = 48 }
  0x63   : > { %941 = dma.hbm_to_vmem [thread:$0]  (!%p1366_p11), %s1362_s11, 256, %s1364_s10, %s1370_s15, %s1558_s23, %s1558_s23, %s1176_s29  }
  0x64   : > { %s1404_s20 = sand.u32 (!%p1266_p8), 1, %s1163_s25   ;;  %p1559_p4 = scmp.ne.s32.totalorder (!%p1266_p8), %s1550_s30, 0 }
  0x65   : > { %s1548_s22 = sshll.u32 (!%p1266_p8), %s1404_s20, 4  ;;  %s304_s18 = scalar_lea.sflag (!%p1266_p8), [#allocation3], %s1404_s20 }
  0x66   : > { %s1410_s12 = scalar_lea.vmem (!%p1266_p8), [#allocation2], %s1548_s22 }
  0x69   : > { %1146 = dma.done.wait (%p1559_p4), %s304_s18, 256  }
  0x6a   : > { %1148 = vsyncadd (%p1559_p4), %s304_s18, 4294967040  ;;  %p1560_p5 = scmp.eq.s32.totalorder %s1247_s28, 0 }
  0x6c   : > { %1150 = dma.done.wait (%p1560_p5), [#allocation6], 640   ;;  %p1561_p8 = pmov %p1560_p5 }
  0x6d   : > { %s851_s9 = sshll.u32 %s1247_s28, 1  ;;  %v1178_v0 = vmov 1   ;;  %v1179_v1 = vmov 0   ;;  %v448_v2 = vld [vmem:[%s1541_s5] sm:$0xff]  ;;  %v449_v3 = vld [vmem:[%s1541_s5 + $0x8] sm:$0xff]  ;;  %v450_v7 = vld [vmem:[%s1541_s5 + $0x10] sm:$0xff] }
  0x6e   : > { %1152 = vsyncadd (%p1561_p8), [#allocation6], 4294966656  ;;  %p357_p11 = scmp.lt.s32.totalorder %s851_s9, 3  ;;  %996 = vset.pattern.permute.xlu1 %v1178_v0  ;;  %995 = vset.pattern.permute.xlu0 %v1179_v1  ;;  %v444_v4 = vld [vmem:[#allocation5] sm:$0xff]  ;;  %v901_v5 = vpack.c.bf16 %v449_v3, %v448_v2  ;;  %v445_v6 = vld [vmem:[#allocation5 + $0x8] sm:$0xff]  ;;  %vm374_vm0 = vcmask 261120  }
  0x6f   : > { %v451_v8 = vld [vmem:[%s1541_s5 + $0x18] sm:$0xff]  ;;  %v909_v9 = vpack.c.bf16 %v445_v6, %v444_v4  ;;  %v446_v11 = vld [vmem:[#allocation5 + $0x10] sm:$0xff]  ;;  %vm423_vm1 = vcmask 39936   ;;  %s866_s15 = sshll.u32 %s1247_s28, 8  ;;  %s709_s23 = scalar_lea.sflag [#allocation4], %s1404_s20 }
  0x70   : > { %s1571_s9 = smov (!%p357_p11, %s851_s9), 3  ;;  %v905_v10 = vpack.c.bf16 %v451_v8, %v450_v7  ;;  %v447_v12 = vld [vmem:[#allocation5 + $0x18] sm:$0xff]  ;;  %v1440_v13 = vld [vmem:[%s1410_s12] sm:$0xff]  ;;  %902 = vmatprep.subr.bf16.mxu1 %v901_v5  ;;  %p1563_p2 = scmp.ne.s32.totalorder %s1555_s16, 0 }
  0x71   : > { %s852_s29 = sshll.u32 %s1571_s9, 3  ;;  %v913_v14 = vpack.c.bf16 %v447_v12, %v446_v11  ;;  %v397_v15 = vmul.f32 %v1440_v13, %v1440_v13  ;;  %910 = vmatprep.subr.bf16.mxu0 %v909_v9  ;;  %904 = vmatpush3.bf16.msra.mxu1 %v901_v5  ;;  %v1459_v23 = vld [vmem:[%s1410_s12 + $0x8] sm:$0xff]  ;;  %s1562_s12 = sshll.u32 %s1404_s20, 4 }
  0x72   : > { %s360_s21 = scalar_lea.vmem %s1536_s0, %s852_s29  ;;  %s366_s22 = scalar_lea.vmem %s1537_s1, %s852_s29  ;;  %912 = vmatpush3.bf16.msra.mxu0 %v909_v9  ;;  %906 = vmatprep.subr.bf16.mxu1 %v905_v10  ;;  %v398_v26 = vmul.f32 %v1459_v23, %v1459_v23 }
  0x73   : > { %v1444_v16 = vld [vmem:[%s360_s21] sm:$0xff]  ;;  %v1446_v17 = vld [vmem:[%s360_s21 + $0x8] sm:$0xff]  ;;  %v399_v24 = vsel %vm374_vm0, %v397_v15, 0.0  ;;  %914 = vmatprep.subr.bf16.mxu0 %v913_v14  ;;  %s355_s29 = scalar_lea.vmem [#allocation8], %s1562_s12  ;;  %s1490_s21 = scalar_lea.hbm %s1543_s7, %s866_s15 }
  0x74   : > { %v1448_v18 = vld [vmem:[%s366_s22] sm:$0xff]  ;;  %v372_v19 = vmul.f32 %v1444_v16, %v1444_v16  ;;  %v373_v20 = vmul.f32 %v1446_v17, %v1446_v17  ;;  %v1454_v21 = vld [vmem:[%s366_s22 + $0x8] sm:$0xff]  ;;  %v400_v27 = vrot.slane %v399_v24, 4  ;;  %v406_v37 = vsel %vm374_vm0, %v398_v26, 0.0  ;;  %s722_s30 = sshll.u32 %s355_s29, 4  ;;  %s1183_s28 = smov [#allocation8]   ;;  %s1492_s30 = int_to_ptr.vmem [resolvable:$true] %s722_s30 }
  0x75   : > { %v421_v22 = vmul.f32 %v1448_v18, %v1448_v18  ;;  %v422_v25 = vmul.f32 %v1454_v21, %v1454_v21  ;;  %908 = vmatpush3.bf16.msra.mxu1 %v905_v10  ;;  %v407_v41 = vrot.slane %v406_v37, 4  ;;  %s1101_s18 = scalar_lea.vmem %s1492_s30, 256  ;;  %s1105_s9 = sshll.u32 %s1183_s28, 4  ;;  %s1106_s9 = int_to_ptr.vmem [resolvable:$false] %s1105_s9 }
  0x76   : > { %v375_v28 = vsel %vm374_vm0, %v372_v19, 0.0  ;;  %v382_v29 = vsel %vm374_vm0, %v373_v20, 0.0  ;;  %v401_v35 = vadd.f32 %v400_v27, %v399_v24  ;;  %916 = vmatpush3.bf16.msra.mxu0 %v913_v14  ;;  %p1102_p0 = scmp.ne.s32.totalorder %s1492_s30, %s1101_s18  ;;  %s1107_s11 = scalar_lea.vmem %s1106_s9, 512 }
  0x77   : > { %v424_v30 = vsel %vm423_vm1, %v421_v22, 0.0  ;;  %v376_v31 = vrot.slane %v375_v28, 4  ;;  %v383_v32 = vrot.slane %v382_v29, 4  ;;  %v431_v34 = vsel %vm423_vm1, %v422_v25, 0.0  ;;  %p1108_p9 = scmp.lt.s32.totalorder %s1492_s30, %s1106_s9  ;;  %p1109_p12 = scmp.lt.s32.totalorder %s1107_s11, %s1101_s18 }
  0x78   : > { %v425_v33 = vrot.slane %v424_v30, 4  ;;  %v432_v36 = vrot.slane %v431_v34, 4  ;;  %v402_v42 = vrot.slane %v401_v35, 2  ;;  %v408_v47 = vadd.f32 %v407_v41, %v406_v37  ;;  %p1103_p3 = pnand %p1102_p0, %p1563_p2 }
  0x79   : > { %v377_v38 = vadd.f32 %v376_v31, %v375_v28  ;;  %v384_v39 = vadd.f32 %v383_v32, %v382_v29  ;;  %v625_v28 = vlaneseq  ;;  %p1110_p1 = por %p1109_p12, %p1108_p9 }
  0x7a   : > { %v426_v40 = vadd.f32 %v425_v33, %v424_v30  ;;  %v433_v43 = vadd.f32 %v432_v36, %v431_v34  ;;  %v403_v48 = vadd.f32 %v402_v42, %v401_v35  ;;  %v409_v53 = vrot.slane %v408_v47, 2  ;;  %v614_v35 = vld [vmem:[#allocation7] sm:$0x1f]  ;;  %p1104_p7 = pneg %p1103_p3 }
  0x7b   : > { %v378_v44 = vrot.slane %v377_v38, 2  ;;  %v385_v45 = vrot.slane %v384_v39, 2  ;;  %v626_v30 = vshrl.u32 %v625_v28, 7 }
  0x7c   : > { %v427_v46 = vrot.slane %v426_v40, 2  ;;  %v434_v49 = vrot.slane %v433_v43, 2  ;;  %v404_v54 = vrot.slane %v403_v48, 1  ;;  %v410_v59 = vadd.f32 %v409_v53, %v408_v47  ;;  %p1111_p13 = pnand %p1110_p1, %p1104_p7 }
  0x7d   : > { %v379_v50 = vadd.f32 %v378_v44, %v377_v38  ;;  %v386_v51 = vadd.f32 %v385_v45, %v384_v39  ;;  %v627_v32 = vsub.s32 0, %v626_v30  ;;  %v643_v34 = vsub.s32 1, %v626_v30 }
  0x7e   : > { %v428_v52 = vadd.f32 %v427_v46, %v426_v40  ;;  %v435_v55 = vadd.f32 %v434_v49, %v433_v43  ;;  %v405_v60 = vadd.f32 %v404_v54, %v403_v48  ;;  %v411_v1 = vrot.slane %v410_v59, 1 }
  0x7f   : > { %v380_v56 = vrot.slane %v379_v50, 1  ;;  %v387_v57 = vrot.slane %v386_v51, 1  ;;  %v628_v37 = vrot.slane %v614_v35, %v627_v32  ;;  %v659_v38 = vsub.s32 2, %v626_v30 }
  0x80   : > { %v429_v58 = vrot.slane %v428_v52, 1  ;;  %v436_v61 = vrot.slane %v435_v55, 1  ;;  %v413_v2 = vmax.f32 %v405_v60, 1e-24  ;;  %v412_v7 = vadd.f32 %v411_v1, %v410_v59 }
  0x81   : > { %v381_v62 = vadd.f32 %v380_v56, %v379_v50  ;;  %v388_v63 = vadd.f32 %v387_v57, %v386_v51  ;;  %v644_v41 = vrot.slane %v614_v35, %v643_v34  ;;  %v675_v42 = vsub.s32 3, %v626_v30 }
  0x82   : > { %v430_v0 = vadd.f32 %v429_v58, %v428_v52  ;;  %v437_v3 = vadd.f32 %v436_v61, %v435_v55  ;;  %1003 = vrsqrt.f32 %v413_v2  ;;  %v414_v9 = vmax.f32 %v412_v7, 1e-24 }
  0x83   : > { %v389_v4 = vmax.f32 %v381_v62, 1e-24  ;;  %v390_v5 = vmax.f32 %v388_v63, 1e-24  ;;  %v660_v45 = vrot.slane %v614_v35, %v659_v38  ;;  %v691_v48 = vsub.s32 4, %v626_v30 }
  0x84   : > { %v438_v6 = vmax.f32 %v430_v0, 1e-24  ;;  %v439_v8 = vmax.f32 %v437_v3, 1e-24  ;;  %v676_v54 = vrot.slane %v614_v35, %v675_v42 }
  0x85   : > { %1005 = vrsqrt.f32 %v389_v4  ;;  %v692_v60 = vrot.slane %v614_v35, %v691_v48 }
  0x86   : > { %1007 = vrsqrt.f32 %v390_v5 }
  0x87   : > { %1009 = vrsqrt.f32 %v438_v6 }
  0x88   : > { %1011 = vrsqrt.f32 %v439_v8  ;;  %v859_v8 = vld [vmem:[%s1542_s6] ss:$0 sm:$0xff] }
  0x89   : > { %1013 = vrsqrt.f32 %v414_v9 }
  0x8c   : > { %v1004_v10 = vpop.eup %1003 }
  0x8d   : > { %v417_v12 = vmul.f32 %v1004_v10, %v1440_v13 }
  0x8f   : > { %v1006_v11 = vpop.eup %1005  ;;  %887 = vmatprep.mubr.msk.f32.mxu1 %vm374_vm0, %v417_v12 }
  0x90   : > { %v1008_v14 = vpop.eup %1007  ;;  %v393_v15 = vmul.f32 %v1006_v11, %v1444_v16  ;;  %v1180_v16 = vmov 2  }
  0x91   : > { %v1010_v19 = vpop.eup %1009  ;;  %v394_v20 = vmul.f32 %v1008_v14, %v1446_v17  ;;  %v1181_v17 = vmov 3  }
  0x92   : > { %v1012_v22 = vpop.eup %1011  ;;  %v442_v24 = vmul.f32 %v1010_v19, %v1448_v18  ;;  %898 = vmatprep.mubr.msk.f32.mxu0 %vm374_vm0, %v393_v15  ;;  %v1182_v18 = vmov 4  }
  0x93   : > { %v1014_v25 = vpop.eup %1013  ;;  %899 = vmatmul.mubr.msk.f32.vlgmr.msra.gmra.mrb[0].mxu0 %vm374_vm0, %v394_v20  ;;  %v443_v26 = vmul.f32 %v1012_v22, %v1454_v21 }
  0x94   : > { %v418_v13 = vmul.f32 %v1014_v25, %v1459_v23  ;;  %634 = vperm.xlu1 %996, %v442_v24   ;;  %617 = vperm.xlu0 %995, %v442_v24  }
  0x96   : > { %888 = vmatmul.mubr.msk.f32.vlgmr.msra.gmra.mrb[0].mxu1 %vm374_vm0, %v418_v13 }
  0x98   : > { %638 = vperm.xlu1 %996, %v443_v26   ;;  %622 = vperm.xlu0 %995, %v443_v26  }
  0x9c   : > { %998 = vset.pattern.permute.xlu1 %v1180_v16  ;;  %997 = vset.pattern.permute.xlu0 %v1180_v16 }
  0x9d   : > { %654 = vperm.xlu1 %998, %v443_v26   ;;  %650 = vperm.xlu0 %997, %v442_v24  }
  0xa1   : > { %999 = vset.pattern.permute.xlu1 %v1181_v17  ;;  %1000 = vset.pattern.permute.xlu0 %v1181_v17 }
  0xa2   : > { %666 = vperm.xlu1 %999, %v442_v24   ;;  %670 = vperm.xlu0 %1000, %v443_v26  }
  0xa6   : > { %1001 = vset.pattern.permute.xlu1 %v1182_v18  ;;  %1002 = vset.pattern.permute.xlu0 %v1182_v18 }
  0xa7   : > { %682 = vperm.xlu1 %1001, %v442_v24  }
  0xab   : > { %686 = vperm.xlu1 %1001, %v443_v26  }
 0x113   : > { %v635_v21 = vpop.permute.xlu1 %634  ;;  %v618_v27 = vpop.permute.xlu0 %617 }
 0x114   : > { %v629_v50 = vmul.f32 %v628_v37, %v618_v27  ;;  %v645_v56 = vmul.f32 %v644_v41, %v635_v21 }
 0x117   : > { %v639_v23 = vpop.permute.xlu1 %638  ;;  %v623_v31 = vpop.permute.xlu0 %622 }
 0x118   : > { %v630_v46 = vmul.f32 %v628_v37, %v623_v31  ;;  %v646_v53 = vmul.f32 %v644_v41, %v639_v23 }
 0x11c   : > { %v655_v29 = vpop.permute.xlu1 %654  ;;  %v651_v36 = vpop.permute.xlu0 %650 }
 0x11d   : > { %v662_v58 = vmul.f32 %v660_v45, %v655_v29  ;;  %v661_v63 = vmul.f32 %v660_v45, %v651_v36 }
 0x121   : > { %v667_v33 = vpop.permute.xlu1 %666  ;;  %v671_v52 = vpop.permute.xlu0 %670 }
 0x122   : > { %v678_v61 = vmul.f32 %v676_v54, %v671_v52  ;;  %v677_v2 = vmul.f32 %v676_v54, %v667_v33 }
 0x126   : > { %v683_v44 = vpop.permute.xlu1 %682 }
 0x127   : > { %v693_v6 = vmul.f32 %v692_v60, %v683_v44 }
 0x12a   : > { %v687_v0 = vpop.permute.xlu1 %686 }
 0x12b   : > { %v694_v4 = vmul.f32 %v692_v60, %v687_v0 }
 0x166   : > { %v900_v39 = vpop.f32.mrb[0].mxu0 }
 0x167   : > { %v605_v40 = vpop.f32.mrb[1].mxu0 }
 0x169   : > { %v889_v43 = vpop.f32.mrb[0].mxu1 }
 0x16a   : > { %v611_v47 = vadd.f32 %v900_v39, %v889_v43  ;;  %v524_v49 = vpop.f32.mrb[1].mxu1 }
 0x16b   : > { %v606_v51 = vadd.f32 %v605_v40, %v524_v49 }
 0x16c   : > { %v632_v55 = vadd.f32 %v630_v46, %v611_v47 }
 0x16d   : > { %v631_v57 = vadd.f32 %v629_v50, %v606_v51 }
 0x16e   : > { %v648_v59 = vadd.f32 %v646_v53, %v632_v55 }
 0x16f   : > { %v647_v62 = vadd.f32 %v645_v56, %v631_v57 }
 0x170   : > { %v664_v1 = vadd.f32 %v662_v58, %v648_v59 }
 0x171   : > { %v663_v3 = vadd.f32 %v661_v63, %v647_v62 }
 0x172   : > { %v680_v5 = vadd.f32 %v678_v61, %v664_v1 }
 0x173   : > { %v679_v7 = vadd.f32 %v677_v2, %v663_v3 }
 0x174   : > { %v696_v9 = vadd.f32 %v694_v4, %v680_v5 }
 0x175   : > { %v695_v10 = vadd.f32 %v693_v6, %v679_v7 }
 0x176   : > { %v705_v11 = vadd.f32 %v859_v8, %v696_v9 }
 0x177   : > { %v704_v12 = vadd.f32 %v859_v8, %v695_v10 }
 0x178   : > { %707 = vst [vmem:[%s355_s29 + $0x8] sm:$0xff] %v705_v11 }
 0x179   : > { %706 = vst [vmem:[%s355_s29] sm:$0xff] %v704_v12 }
 0x17a   : > { %1114 = shalt.err (!%p1111_p13)
}
 0x17b   : > { %s1115_s10 = scalar_lea.hbm %s1490_s21, 256  ;;  %s1119_s12 = scalar_lea.hbm %s1543_s7, 512 }
 0x17c   : > { %p1116_p6 = scmp.ne.s32.totalorder %s1490_s21, %s1115_s10  ;;  %p1120_p5 = scmp.lt.u32.totalorder %s1490_s21, %s1543_s7 }
 0x17d   : > { %p1121_p8 = scmp.lt.u32.totalorder %s1119_s12, %s1115_s10  ;;  %p1123_p0 = scmp.lt.u32.totalorder %s1115_s10, %s1490_s21 }
 0x17e   : > { %p1117_p10 = pnand %p1116_p6, %p1563_p2 }
 0x17f   : > { %p1122_p11 = por %p1121_p8, %p1120_p5 }
 0x180   : > { %p1118_p4 = pneg %p1117_p10 }
 0x181   : > { %p1124_p3 = por %p1123_p0, %p1122_p11 }
 0x183   : > { %p1125_p7 = pnand %p1124_p3, %p1118_p4 }
 0x185   : > { %1128 = shalt.err (!%p1125_p7)
}
 0x186   : > { %s1184_s19 = smov 128   ;;  %s1185_s14 = smov 8  }
 0x187   : > { %929 = dma.vmem_to_hbm [thread:$0]  (%p1563_p2), %s1492_s30, 256, %s1490_s21, %s709_s23, %s1184_s19, %s1184_s19, %s1185_s14  }
 0x188 PF: > { %s737_s18 = sand.u32 1, %s1159_s24   ;;  %p1564_p9 = scmp.ne.s32.totalorder %s1551_s8, 0 }
 0x189   : > { %p1565_p12 = scmp.ge.s32.totalorder %s1171_s27, 2  ;;  %s738_s28 = scalar_lea.sflag [#allocation4], %s737_s18 }
 0x18b   : > { %p943_p1 = pnand %p1565_p12, %p1564_p9 }
 0x18d   : > { %1154 = dma.done.wait (!%p943_p1), %s738_s28, 256  }
 0x18e   : > { %1156 = vsyncadd (!%p943_p1), %s738_s28, 4294967040  ;;  %p21_p13 = scmp.ge.s32.totalorder %s1339_s13, 4   ;;  %s1566_s24 = smov %s1163_s25 }
 0x18f   : > { %s1567_s25 = smov %s1167_s26  ;;  %s1568_s26 = smov %s1355_s17 }
 0x190   : > { %s1569_s27 = smov %s1339_s13  ;;  %23 = sbr.rel (!%p21_p13) target bundleno = 8 (0x8), region = 107 }
 0x197   :  { %743 = vsyncpa [#allocation3], 1 }
 0x198   :  { %745 = vsyncpa [#allocation3 + $0x1], 1 }
 0x199   :  { %746 = vsyncpa [#allocation6], 1 }
 0x19a   :  { %747 = vsyncpa [#allocation4], 1 }
 0x19b   :  { %749 = vsyncpa [#allocation4 + $0x1], 1 }

// kernel: tpu_custom_call.1
= control target key start
LH: loop header
LB: loop body
LE: loop exit
PB: predicated region body
PF: predicated region fallthrough
CT: control target
= control target key end

     0   :  { %s1536_s0 = inlined_call_operand.vmem [shape: f32[4,8,32], index: 0, kind: input, shape index: {}]   ;;  %s1537_s1 = inlined_call_operand.vmem [shape: f32[4,8,5], index: 1, kind: input, shape index: {}]   ;;  %s1538_s2 = inlined_call_operand.hbm [shape: f32[4,8,32], index: 2, kind: input, shape index: {}]   ;;  %s1539_s3 = inlined_call_operand.hbm [shape: f32[32,128], index: 3, kind: input, shape index: {}]   ;;  %s1540_s4 = inlined_call_operand.hbm [shape: f32[5,128], index: 4, kind: input, shape index: {}]   ;;  %s1541_s5 = inlined_call_operand.vmem [shape: f32[32,128], index: 5, kind: input, shape index: {}]   ;;  %s1542_s6 = inlined_call_operand.vmem [shape: f32[1,128], index: 6, kind: input, shape index: {}]   ;;  %s1543_s7 = inlined_call_operand.hbm [shape: f32[4,8,128], index: 7, kind: output, shape index: {}]  }
   0x1   :  { %1549 = sst [smem:[#allocation12_spill]] %s1538_s2 }
   0x2   :  { %12 = vsyncpa [#allocation3], 0 }
   0x3   :  { %14 = vsyncpa [#allocation3 + $0x1], 0 }
   0x4   :  { %15 = vsyncpa [#allocation6], 0 }
   0x5   :  { %16 = vsyncpa [#allocation4], 0 }
   0x6   :  { %18 = vsyncpa [#allocation4 + $0x1], 0  ;;  %s1226_s24 = smov 0   ;;  %s1228_s25 = smov 0  }
   0x7   :  { %s1230_s26 = smov 0   ;;  %s1232_s27 = smov 0  }
   0x8 LB: > { %s1247_s28 = sadd.s32 4294967295, %s1171_s27   ;;  %s838_s29 = sadd.s32 4294967294, %s1171_s27   ;;  %s1171_s27 = sphi %s1232_s27, %s1569_s27   ;;  %s1167_s26 = sphi %s1230_s26, %s1568_s26   ;;  %s1163_s25 = sphi %s1228_s25, %s1567_s25   ;;  %s1159_s24 = sphi %s1226_s24, %s1566_s24  }
   0x9   : > { %p96_p0 = scmp.ne.s32.totalorder %s1163_s25, %s1159_s24  ;;  %p1544_p1 = scmp.eq.s32.totalorder %s1247_s28, 0 }
   0xa   : > { %p210_p3 = scmp.eq.s32.totalorder %s838_s29, 1  ;;  %p839_p5 = scmp.ge.s32.totalorder %s1171_s27, 1 }
   0xb   : > { %p1256_p4 = por %p1544_p1, %p96_p0  ;;  %p217_p7 = scmp.lt.s32.totalorder %s1171_s27, 3 }
   0xc   : > { %p1261_p6 = por %p210_p3, %p96_p0  ;;  %s1173_s10 = smov [#allocation5]  }
   0xd   : > { %s1550_s30 = scalar_select %p1256_p4, 1, 0 }
   0xe   : > { %s1551_s8 = scalar_select %p1261_p6, 1, 0 }
   0xf   : > { %p1266_p8 = pnand %p839_p5, %p217_p7  ;;  %s229_s11 = sshll.u32 %s1173_s10, 4  ;;  %s1270_s11 = int_to_ptr.vmem [resolvable:$true] %s229_s11 }
  0x10   : > { %s1174_s13 = smov [#allocation7]   ;;  %s1015_s17 = scalar_lea.hbm %s1539_s3, 512 }
  0x11   : > { %p931_p9 = pneg %p1266_p8  ;;  %s243_s14 = sshll.u32 %s1174_s13, 4  ;;  %s1281_s14 = int_to_ptr.vmem [resolvable:$true] %s243_s14 }
  0x12   : > { %p1016_p12 = scmp.ne.s32.totalorder %s1539_s3, %s1015_s17  ;;  %p1022_p5 = scmp.lt.u32.totalorder %s1015_s17, %s1539_s3 }
  0x13   : > { %p1277_p11 = pnand %p931_p9, %p1544_p1 }
  0x15   : > { %p1017_p13 = pneg %p1277_p11 }
  0x17   : > { %p1018_p0 = pnand %p1017_p13, %p1016_p12 }
  0x19   : > { %p1019_p3 = pneg %p1018_p0 }
  0x1b   : > { %p1024_p7 = pnand %p1022_p5, %p1019_p3 }
  0x1d   : > { %1027 = shalt.err (!%p1024_p7)
}
  0x1e   : > { %s1028_s22 = scalar_lea.vmem %s1270_s11, 512  ;;  %p1036_p2 = scmp.lt.s32.totalorder %s1270_s11, %s1270_s11 }
  0x1f   : > { %p1029_p9 = scmp.ne.s32.totalorder %s1270_s11, %s1028_s22  ;;  %p1037_p12 = scmp.lt.s32.totalorder %s1028_s22, %s1028_s22 }
  0x21   : > { %p1031_p10 = pnand %p1029_p9, %p1017_p13  ;;  %p1038_p0 = por %p1037_p12, %p1036_p2 }
  0x23   : > { %p1032_p1 = pneg %p1031_p10 }
  0x25   : > { %p1039_p6 = pnand %p1038_p0, %p1032_p1 }
  0x27   : > { %1042 = shalt.err (!%p1039_p6)
}
  0x28   : > { %s1545_s23 = smov 128   ;;  %s1176_s29 = smov 8  }
  0x29   : > { %934 = dma.hbm_to_vmem [thread:$0]  (!%p1277_p11), %s1539_s3, 512, %s1270_s11, [#allocation6], %s1545_s23, %s1545_s23, %s1176_s29  }
  0x2a   : > { %s1043_s17 = scalar_lea.hbm %s1540_s4, 128 }
  0x2b   : > { %p1044_p1 = scmp.ne.s32.totalorder %s1540_s4, %s1043_s17  ;;  %p1050_p10 = scmp.lt.u32.totalorder %s1043_s17, %s1540_s4 }
  0x2d   : > { %p1046_p2 = pnand %p1044_p1, %p1017_p13 }
  0x2f   : > { %p1047_p6 = pneg %p1046_p2 }
  0x31   : > { %p1052_p3 = pnand %p1050_p10, %p1047_p6 }
  0x33   : > { %1055 = shalt.err (!%p1052_p3)
}
  0x34   : > { %s1056_s11 = scalar_lea.vmem %s1281_s14, 128  ;;  %p1064_p12 = scmp.lt.s32.totalorder %s1281_s14, %s1281_s14 }
  0x35   : > { %p1057_p5 = scmp.ne.s32.totalorder %s1281_s14, %s1056_s11  ;;  %p1065_p0 = scmp.lt.s32.totalorder %s1056_s11, %s1056_s11 }
  0x37   : > { %p1059_p7 = pnand %p1057_p5, %p1017_p13  ;;  %p1066_p1 = por %p1065_p0, %p1064_p12 }
  0x39   : > { %p1060_p9 = pneg %p1059_p7 }
  0x3b   : > { %p1067_p2 = pnand %p1066_p1, %p1060_p9 }
  0x3d   : > { %1070 = shalt.err (!%p1067_p2)
}
  0x3e   : > { %937 = dma.hbm_to_vmem [thread:$0]  (!%p1277_p11), %s1540_s4, 128, %s1281_s14, [#allocation6]  }
  0x3f   : > { %s1339_s13 = sadd.s32 1, %s1171_s27   ;;  %s83_s12 = sadd.s32 1, %s1167_s26 }
  0x40   : > { %s80_s15 = ssub.s32 %s1171_s27, %s1339_s13  ;;  %p90_p13 = scmp.ne.s32.totalorder %s1167_s26, %s1163_s25 }
  0x41   : > { %p81_p6 = scmp.eq.s32.totalorder %s80_s15, 0  ;;  %p91_p10 = scmp.eq.s32.totalorder %s1171_s27, 0 }
  0x42   : > { %p1554_p3 = scmp.eq.s32.totalorder %s1247_s28, 1  ;;  %p948_p7 = scmp.lt.s32.totalorder %s1171_s27, 2 }
  0x43   : > { %s1355_s17 = scalar_select %p81_p6, %s1167_s26, %s83_s12  }
  0x44   : > { %p1349_p5 = por %p1554_p3, %p90_p13  ;;  %p92_p9 = por %p91_p10, %p90_p13 }
  0x45   : > { %s278_s18 = sand.u32 1, %s1167_s26   ;;  %s865_s14 = sshll.u32 %s1171_s27, 8 }
  0x46   : > { %s1555_s16 = scalar_select %p1349_p5, 1, 0 }
  0x47   : > { %s843_s19 = sshll.u32 %s278_s18, 4  ;;  %s1556_s2 = sld [smem:[#allocation12_spill]] }
  0x48   : > { %s282_s22 = scalar_lea.vmem [#allocation2], %s843_s19  ;;  %p1366_p11 = pnand %p948_p7, %p92_p9 }
  0x49   : > { %s289_s10 = sshll.u32 %s282_s22, 4  ;;  %s1370_s15 = scalar_lea.sflag [#allocation3], %s278_s18  ;;  %s1364_s10 = int_to_ptr.vmem [resolvable:$true] %s289_s10 }
  0x4a   : > { %p1073_p0 = pneg %p1366_p11 }
  0x4d   : > { %s1362_s11 = scalar_lea.hbm %s1556_s2, %s865_s14  ;;  %s1076_s20 = scalar_lea.hbm %s1556_s2, 512 }
  0x4e   : > { %s1071_s23 = scalar_lea.hbm %s1362_s11, 256  ;;  %p1077_p13 = scmp.lt.u32.totalorder %s1362_s11, %s1556_s2 }
  0x4f   : > { %p1072_p12 = scmp.ne.s32.totalorder %s1362_s11, %s1071_s23  ;;  %p1078_p6 = scmp.lt.u32.totalorder %s1076_s20, %s1071_s23 }
  0x50   : > { %p1080_p3 = scmp.lt.u32.totalorder %s1071_s23, %s1362_s11 }
  0x51   : > { %p1074_p1 = pnand %p1073_p0, %p1072_p12  ;;  %p1079_p10 = por %p1078_p6, %p1077_p13 }
  0x53   : > { %p1075_p2 = pneg %p1074_p1  ;;  %p1081_p7 = por %p1080_p3, %p1079_p10 }
  0x55   : > { %p1082_p9 = pnand %p1081_p7, %p1075_p2 }
  0x57   : > { %1085 = shalt.err (!%p1082_p9)
}
  0x58   : > { %s1086_s18 = scalar_lea.vmem %s1364_s10, 256  ;;  %s1177_s19 = smov [#allocation2]  }
  0x59   : > { %p1087_p12 = scmp.ne.s32.totalorder %s1364_s10, %s1086_s18  ;;  %s1091_s14 = sshll.u32 %s1177_s19, 4  ;;  %s1092_s14 = int_to_ptr.vmem [resolvable:$false] %s1091_s14 }
  0x5a   : > { %s1093_s21 = scalar_lea.vmem %s1092_s14, 512  ;;  %p1094_p4 = scmp.lt.s32.totalorder %s1364_s10, %s1092_s14 }
  0x5b   : > { %p1089_p1 = pnand %p1087_p12, %p1073_p0  ;;  %p1095_p13 = scmp.lt.s32.totalorder %s1093_s21, %s1086_s18 }
  0x5d   : > { %p1090_p5 = pneg %p1089_p1  ;;  %p1096_p6 = por %p1095_p13, %p1094_p4 }
  0x5f   : > { %p1097_p10 = pnand %p1096_p6, %p1090_p5 }
  0x61   : > { %1100 = shalt.err (!%p1097_p10)
}
  0x62   : > { %s1558_s23 = smov 128   ;;  %301 = sbr.rel (%p1266_p8) target bundleno = 392 (0x188), region = 48 }
  0x63   : > { %941 = dma.hbm_to_vmem [thread:$0]  (!%p1366_p11), %s1362_s11, 256, %s1364_s10, %s1370_s15, %s1558_s23, %s1558_s23, %s1176_s29  }
  0x64   : > { %s1404_s20 = sand.u32 (!%p1266_p8), 1, %s1163_s25   ;;  %p1559_p4 = scmp.ne.s32.totalorder (!%p1266_p8), %s1550_s30, 0 }
  0x65   : > { %s1548_s22 = sshll.u32 (!%p1266_p8), %s1404_s20, 4  ;;  %s304_s18 = scalar_lea.sflag (!%p1266_p8), [#allocation3], %s1404_s20 }
  0x66   : > { %s1410_s12 = scalar_lea.vmem (!%p1266_p8), [#allocation2], %s1548_s22 }
  0x69   : > { %1146 = dma.done.wait (%p1559_p4), %s304_s18, 256  }
  0x6a   : > { %1148 = vsyncadd (%p1559_p4), %s304_s18, 4294967040  ;;  %p1560_p5 = scmp.eq.s32.totalorder %s1247_s28, 0 }
  0x6c   : > { %1150 = dma.done.wait (%p1560_p5), [#allocation6], 640   ;;  %p1561_p8 = pmov %p1560_p5 }
  0x6d   : > { %s851_s9 = sshll.u32 %s1247_s28, 1  ;;  %v1178_v0 = vmov 1   ;;  %v1179_v1 = vmov 0   ;;  %v448_v2 = vld [vmem:[%s1541_s5] sm:$0xff]  ;;  %v449_v3 = vld [vmem:[%s1541_s5 + $0x8] sm:$0xff]  ;;  %v450_v7 = vld [vmem:[%s1541_s5 + $0x10] sm:$0xff] }
  0x6e   : > { %1152 = vsyncadd (%p1561_p8), [#allocation6], 4294966656  ;;  %p357_p11 = scmp.lt.s32.totalorder %s851_s9, 3  ;;  %996 = vset.pattern.permute.xlu1 %v1178_v0  ;;  %995 = vset.pattern.permute.xlu0 %v1179_v1  ;;  %v444_v4 = vld [vmem:[#allocation5] sm:$0xff]  ;;  %v901_v5 = vpack.c.bf16 %v449_v3, %v448_v2  ;;  %v445_v6 = vld [vmem:[#allocation5 + $0x8] sm:$0xff]  ;;  %vm374_vm0 = vcmask 261120  }
  0x6f   : > { %v451_v8 = vld [vmem:[%s1541_s5 + $0x18] sm:$0xff]  ;;  %v909_v9 = vpack.c.bf16 %v445_v6, %v444_v4  ;;  %v446_v11 = vld [vmem:[#allocation5 + $0x10] sm:$0xff]  ;;  %vm423_vm1 = vcmask 39936   ;;  %s866_s15 = sshll.u32 %s1247_s28, 8  ;;  %s709_s23 = scalar_lea.sflag [#allocation4], %s1404_s20 }
  0x70   : > { %s1571_s9 = smov (!%p357_p11, %s851_s9), 3  ;;  %v905_v10 = vpack.c.bf16 %v451_v8, %v450_v7  ;;  %v447_v12 = vld [vmem:[#allocation5 + $0x18] sm:$0xff]  ;;  %v1440_v13 = vld [vmem:[%s1410_s12] sm:$0xff]  ;;  %902 = vmatprep.subr.bf16.mxu1 %v901_v5  ;;  %p1563_p2 = scmp.ne.s32.totalorder %s1555_s16, 0 }
  0x71   : > { %s852_s29 = sshll.u32 %s1571_s9, 3  ;;  %v913_v14 = vpack.c.bf16 %v447_v12, %v446_v11  ;;  %v397_v15 = vmul.f32 %v1440_v13, %v1440_v13  ;;  %910 = vmatprep.subr.bf16.mxu0 %v909_v9  ;;  %904 = vmatpush3.bf16.msra.mxu1 %v901_v5  ;;  %v1459_v23 = vld [vmem:[%s1410_s12 + $0x8] sm:$0xff]  ;;  %s1562_s12 = sshll.u32 %s1404_s20, 4 }
  0x72   : > { %s360_s21 = scalar_lea.vmem %s1536_s0, %s852_s29  ;;  %s366_s22 = scalar_lea.vmem %s1537_s1, %s852_s29  ;;  %912 = vmatpush3.bf16.msra.mxu0 %v909_v9  ;;  %906 = vmatprep.subr.bf16.mxu1 %v905_v10  ;;  %v398_v26 = vmul.f32 %v1459_v23, %v1459_v23 }
  0x73   : > { %v1444_v16 = vld [vmem:[%s360_s21] sm:$0xff]  ;;  %v1446_v17 = vld [vmem:[%s360_s21 + $0x8] sm:$0xff]  ;;  %v399_v24 = vsel %vm374_vm0, %v397_v15, 0.0  ;;  %914 = vmatprep.subr.bf16.mxu0 %v913_v14  ;;  %s355_s29 = scalar_lea.vmem [#allocation8], %s1562_s12  ;;  %s1490_s21 = scalar_lea.hbm %s1543_s7, %s866_s15 }
  0x74   : > { %v1448_v18 = vld [vmem:[%s366_s22] sm:$0xff]  ;;  %v372_v19 = vmul.f32 %v1444_v16, %v1444_v16  ;;  %v373_v20 = vmul.f32 %v1446_v17, %v1446_v17  ;;  %v1454_v21 = vld [vmem:[%s366_s22 + $0x8] sm:$0xff]  ;;  %v400_v27 = vrot.slane %v399_v24, 4  ;;  %v406_v37 = vsel %vm374_vm0, %v398_v26, 0.0  ;;  %s722_s30 = sshll.u32 %s355_s29, 4  ;;  %s1183_s28 = smov [#allocation8]   ;;  %s1492_s30 = int_to_ptr.vmem [resolvable:$true] %s722_s30 }
  0x75   : > { %v421_v22 = vmul.f32 %v1448_v18, %v1448_v18  ;;  %v422_v25 = vmul.f32 %v1454_v21, %v1454_v21  ;;  %908 = vmatpush3.bf16.msra.mxu1 %v905_v10  ;;  %v407_v41 = vrot.slane %v406_v37, 4  ;;  %s1101_s18 = scalar_lea.vmem %s1492_s30, 256  ;;  %s1105_s9 = sshll.u32 %s1183_s28, 4  ;;  %s1106_s9 = int_to_ptr.vmem [resolvable:$false] %s1105_s9 }
  0x76   : > { %v375_v28 = vsel %vm374_vm0, %v372_v19, 0.0  ;;  %v382_v29 = vsel %vm374_vm0, %v373_v20, 0.0  ;;  %v401_v35 = vadd.f32 %v400_v27, %v399_v24  ;;  %916 = vmatpush3.bf16.msra.mxu0 %v913_v14  ;;  %p1102_p0 = scmp.ne.s32.totalorder %s1492_s30, %s1101_s18  ;;  %s1107_s11 = scalar_lea.vmem %s1106_s9, 512 }
  0x77   : > { %v424_v30 = vsel %vm423_vm1, %v421_v22, 0.0  ;;  %v376_v31 = vrot.slane %v375_v28, 4  ;;  %v383_v32 = vrot.slane %v382_v29, 4  ;;  %v431_v34 = vsel %vm423_vm1, %v422_v25, 0.0  ;;  %p1108_p9 = scmp.lt.s32.totalorder %s1492_s30, %s1106_s9  ;;  %p1109_p12 = scmp.lt.s32.totalorder %s1107_s11, %s1101_s18 }
  0x78   : > { %v425_v33 = vrot.slane %v424_v30, 4  ;;  %v432_v36 = vrot.slane %v431_v34, 4  ;;  %v402_v42 = vrot.slane %v401_v35, 2  ;;  %v408_v47 = vadd.f32 %v407_v41, %v406_v37  ;;  %p1103_p3 = pnand %p1102_p0, %p1563_p2 }
  0x79   : > { %v377_v38 = vadd.f32 %v376_v31, %v375_v28  ;;  %v384_v39 = vadd.f32 %v383_v32, %v382_v29  ;;  %v625_v28 = vlaneseq  ;;  %p1110_p1 = por %p1109_p12, %p1108_p9 }
  0x7a   : > { %v426_v40 = vadd.f32 %v425_v33, %v424_v30  ;;  %v433_v43 = vadd.f32 %v432_v36, %v431_v34  ;;  %v403_v48 = vadd.f32 %v402_v42, %v401_v35  ;;  %v409_v53 = vrot.slane %v408_v47, 2  ;;  %v614_v35 = vld [vmem:[#allocation7] sm:$0x1f]  ;;  %p1104_p7 = pneg %p1103_p3 }
  0x7b   : > { %v378_v44 = vrot.slane %v377_v38, 2  ;;  %v385_v45 = vrot.slane %v384_v39, 2  ;;  %v626_v30 = vshrl.u32 %v625_v28, 7 }
  0x7c   : > { %v427_v46 = vrot.slane %v426_v40, 2  ;;  %v434_v49 = vrot.slane %v433_v43, 2  ;;  %v404_v54 = vrot.slane %v403_v48, 1  ;;  %v410_v59 = vadd.f32 %v409_v53, %v408_v47  ;;  %p1111_p13 = pnand %p1110_p1, %p1104_p7 }
  0x7d   : > { %v379_v50 = vadd.f32 %v378_v44, %v377_v38  ;;  %v386_v51 = vadd.f32 %v385_v45, %v384_v39  ;;  %v627_v32 = vsub.s32 0, %v626_v30  ;;  %v643_v34 = vsub.s32 1, %v626_v30 }
  0x7e   : > { %v428_v52 = vadd.f32 %v427_v46, %v426_v40  ;;  %v435_v55 = vadd.f32 %v434_v49, %v433_v43  ;;  %v405_v60 = vadd.f32 %v404_v54, %v403_v48  ;;  %v411_v1 = vrot.slane %v410_v59, 1 }
  0x7f   : > { %v380_v56 = vrot.slane %v379_v50, 1  ;;  %v387_v57 = vrot.slane %v386_v51, 1  ;;  %v628_v37 = vrot.slane %v614_v35, %v627_v32  ;;  %v659_v38 = vsub.s32 2, %v626_v30 }
  0x80   : > { %v429_v58 = vrot.slane %v428_v52, 1  ;;  %v436_v61 = vrot.slane %v435_v55, 1  ;;  %v413_v2 = vmax.f32 %v405_v60, 1e-24  ;;  %v412_v7 = vadd.f32 %v411_v1, %v410_v59 }
  0x81   : > { %v381_v62 = vadd.f32 %v380_v56, %v379_v50  ;;  %v388_v63 = vadd.f32 %v387_v57, %v386_v51  ;;  %v644_v41 = vrot.slane %v614_v35, %v643_v34  ;;  %v675_v42 = vsub.s32 3, %v626_v30 }
  0x82   : > { %v430_v0 = vadd.f32 %v429_v58, %v428_v52  ;;  %v437_v3 = vadd.f32 %v436_v61, %v435_v55  ;;  %1003 = vrsqrt.f32 %v413_v2  ;;  %v414_v9 = vmax.f32 %v412_v7, 1e-24 }
  0x83   : > { %v389_v4 = vmax.f32 %v381_v62, 1e-24  ;;  %v390_v5 = vmax.f32 %v388_v63, 1e-24  ;;  %v660_v45 = vrot.slane %v614_v35, %v659_v38  ;;  %v691_v48 = vsub.s32 4, %v626_v30 }
  0x84   : > { %v438_v6 = vmax.f32 %v430_v0, 1e-24  ;;  %v439_v8 = vmax.f32 %v437_v3, 1e-24  ;;  %v676_v54 = vrot.slane %v614_v35, %v675_v42 }
  0x85   : > { %1005 = vrsqrt.f32 %v389_v4  ;;  %v692_v60 = vrot.slane %v614_v35, %v691_v48 }
  0x86   : > { %1007 = vrsqrt.f32 %v390_v5 }
  0x87   : > { %1009 = vrsqrt.f32 %v438_v6 }
  0x88   : > { %1011 = vrsqrt.f32 %v439_v8  ;;  %v859_v8 = vld [vmem:[%s1542_s6] ss:$0 sm:$0xff] }
  0x89   : > { %1013 = vrsqrt.f32 %v414_v9 }
  0x8c   : > { %v1004_v10 = vpop.eup %1003 }
  0x8d   : > { %v417_v12 = vmul.f32 %v1004_v10, %v1440_v13 }
  0x8f   : > { %v1006_v11 = vpop.eup %1005  ;;  %887 = vmatprep.mubr.msk.f32.mxu1 %vm374_vm0, %v417_v12 }
  0x90   : > { %v1008_v14 = vpop.eup %1007  ;;  %v393_v15 = vmul.f32 %v1006_v11, %v1444_v16  ;;  %v1180_v16 = vmov 2  }
  0x91   : > { %v1010_v19 = vpop.eup %1009  ;;  %v394_v20 = vmul.f32 %v1008_v14, %v1446_v17  ;;  %v1181_v17 = vmov 3  }
  0x92   : > { %v1012_v22 = vpop.eup %1011  ;;  %v442_v24 = vmul.f32 %v1010_v19, %v1448_v18  ;;  %898 = vmatprep.mubr.msk.f32.mxu0 %vm374_vm0, %v393_v15  ;;  %v1182_v18 = vmov 4  }
  0x93   : > { %v1014_v25 = vpop.eup %1013  ;;  %899 = vmatmul.mubr.msk.f32.vlgmr.msra.gmra.mrb[0].mxu0 %vm374_vm0, %v394_v20  ;;  %v443_v26 = vmul.f32 %v1012_v22, %v1454_v21 }
  0x94   : > { %v418_v13 = vmul.f32 %v1014_v25, %v1459_v23  ;;  %634 = vperm.xlu1 %996, %v442_v24   ;;  %617 = vperm.xlu0 %995, %v442_v24  }
  0x96   : > { %888 = vmatmul.mubr.msk.f32.vlgmr.msra.gmra.mrb[0].mxu1 %vm374_vm0, %v418_v13 }
  0x98   : > { %638 = vperm.xlu1 %996, %v443_v26   ;;  %622 = vperm.xlu0 %995, %v443_v26  }
  0x9c   : > { %998 = vset.pattern.permute.xlu1 %v1180_v16  ;;  %997 = vset.pattern.permute.xlu0 %v1180_v16 }
  0x9d   : > { %654 = vperm.xlu1 %998, %v443_v26   ;;  %650 = vperm.xlu0 %997, %v442_v24  }
  0xa1   : > { %999 = vset.pattern.permute.xlu1 %v1181_v17  ;;  %1000 = vset.pattern.permute.xlu0 %v1181_v17 }
  0xa2   : > { %666 = vperm.xlu1 %999, %v442_v24   ;;  %670 = vperm.xlu0 %1000, %v443_v26  }
  0xa6   : > { %1001 = vset.pattern.permute.xlu1 %v1182_v18  ;;  %1002 = vset.pattern.permute.xlu0 %v1182_v18 }
  0xa7   : > { %682 = vperm.xlu1 %1001, %v442_v24  }
  0xab   : > { %686 = vperm.xlu1 %1001, %v443_v26  }
 0x113   : > { %v635_v21 = vpop.permute.xlu1 %634  ;;  %v618_v27 = vpop.permute.xlu0 %617 }
 0x114   : > { %v629_v50 = vmul.f32 %v628_v37, %v618_v27  ;;  %v645_v56 = vmul.f32 %v644_v41, %v635_v21 }
 0x117   : > { %v639_v23 = vpop.permute.xlu1 %638  ;;  %v623_v31 = vpop.permute.xlu0 %622 }
 0x118   : > { %v630_v46 = vmul.f32 %v628_v37, %v623_v31  ;;  %v646_v53 = vmul.f32 %v644_v41, %v639_v23 }
 0x11c   : > { %v655_v29 = vpop.permute.xlu1 %654  ;;  %v651_v36 = vpop.permute.xlu0 %650 }
 0x11d   : > { %v662_v58 = vmul.f32 %v660_v45, %v655_v29  ;;  %v661_v63 = vmul.f32 %v660_v45, %v651_v36 }
 0x121   : > { %v667_v33 = vpop.permute.xlu1 %666  ;;  %v671_v52 = vpop.permute.xlu0 %670 }
 0x122   : > { %v678_v61 = vmul.f32 %v676_v54, %v671_v52  ;;  %v677_v2 = vmul.f32 %v676_v54, %v667_v33 }
 0x126   : > { %v683_v44 = vpop.permute.xlu1 %682 }
 0x127   : > { %v693_v6 = vmul.f32 %v692_v60, %v683_v44 }
 0x12a   : > { %v687_v0 = vpop.permute.xlu1 %686 }
 0x12b   : > { %v694_v4 = vmul.f32 %v692_v60, %v687_v0 }
 0x166   : > { %v900_v39 = vpop.f32.mrb[0].mxu0 }
 0x167   : > { %v605_v40 = vpop.f32.mrb[1].mxu0 }
 0x169   : > { %v889_v43 = vpop.f32.mrb[0].mxu1 }
 0x16a   : > { %v611_v47 = vadd.f32 %v900_v39, %v889_v43  ;;  %v524_v49 = vpop.f32.mrb[1].mxu1 }
 0x16b   : > { %v606_v51 = vadd.f32 %v605_v40, %v524_v49 }
 0x16c   : > { %v632_v55 = vadd.f32 %v630_v46, %v611_v47 }
 0x16d   : > { %v631_v57 = vadd.f32 %v629_v50, %v606_v51 }
 0x16e   : > { %v648_v59 = vadd.f32 %v646_v53, %v632_v55 }
 0x16f   : > { %v647_v62 = vadd.f32 %v645_v56, %v631_v57 }
 0x170   : > { %v664_v1 = vadd.f32 %v662_v58, %v648_v59 }
 0x171   : > { %v663_v3 = vadd.f32 %v661_v63, %v647_v62 }
 0x172   : > { %v680_v5 = vadd.f32 %v678_v61, %v664_v1 }
 0x173   : > { %v679_v7 = vadd.f32 %v677_v2, %v663_v3 }
 0x174   : > { %v696_v9 = vadd.f32 %v694_v4, %v680_v5 }
 0x175   : > { %v695_v10 = vadd.f32 %v693_v6, %v679_v7 }
 0x176   : > { %v705_v11 = vadd.f32 %v859_v8, %v696_v9 }
 0x177   : > { %v704_v12 = vadd.f32 %v859_v8, %v695_v10 }
 0x178   : > { %707 = vst [vmem:[%s355_s29 + $0x8] sm:$0xff] %v705_v11 }
 0x179   : > { %706 = vst [vmem:[%s355_s29] sm:$0xff] %v704_v12 }
 0x17a   : > { %1114 = shalt.err (!%p1111_p13)
}
 0x17b   : > { %s1115_s10 = scalar_lea.hbm %s1490_s21, 256  ;;  %s1119_s12 = scalar_lea.hbm %s1543_s7, 512 }
 0x17c   : > { %p1116_p6 = scmp.ne.s32.totalorder %s1490_s21, %s1115_s10  ;;  %p1120_p5 = scmp.lt.u32.totalorder %s1490_s21, %s1543_s7 }
 0x17d   : > { %p1121_p8 = scmp.lt.u32.totalorder %s1119_s12, %s1115_s10  ;;  %p1123_p0 = scmp.lt.u32.totalorder %s1115_s10, %s1490_s21 }
 0x17e   : > { %p1117_p10 = pnand %p1116_p6, %p1563_p2 }
 0x17f   : > { %p1122_p11 = por %p1121_p8, %p1120_p5 }
 0x180   : > { %p1118_p4 = pneg %p1117_p10 }
 0x181   : > { %p1124_p3 = por %p1123_p0, %p1122_p11 }
 0x183   : > { %p1125_p7 = pnand %p1124_p3, %p1118_p4 }
 0x185   : > { %1128 = shalt.err (!%p1125_p7)
}
 0x186   : > { %s1184_s19 = smov 128   ;;  %s1185_s14 = smov 8  }
 0x187   : > { %929 = dma.vmem_to_hbm [thread:$0]  (%p1563_p2), %s1492_s30, 256, %s1490_s21, %s709_s23, %s1184_s19, %s1184_s19, %s1185_s14  }
 0x188 PF: > { %s737_s18 = sand.u32 1, %s1159_s24   ;;  %p1564_p9 = scmp.ne.s32.totalorder %s1551_s8, 0 }
 0x189   : > { %p1565_p12 = scmp.ge.s32.totalorder %s1171_s27, 2  ;;  %s738_s28 = scalar_lea.sflag [#allocation4], %s737_s18 }
 0x18b   : > { %p943_p1 = pnand %p1565_p12, %p1564_p9 }
 0x18d   : > { %1154 = dma.done.wait (!%p943_p1), %s738_s28, 256  }
 0x18e   : > { %1156 = vsyncadd (!%p943_p1), %s738_s28, 4294967040  ;;  %p21_p13 = scmp.ge.s32.totalorder %s1339_s13, 4   ;;  %s1566_s24 = smov %s1163_s25 }
 0x18f   : > { %s1567_s25 = smov %s1167_s26  ;;  %s1568_s26 = smov %s1355_s17 }
 0x190   : > { %s1569_s27 = smov %s1339_s13  ;;  %23 = sbr.rel (!%p21_p13) target bundleno = 8 (0x8), region = 107 }
 0x197   :  { %743 = vsyncpa [#allocation3], 1 }
 0x198   :  { %745 = vsyncpa [#allocation3 + $0x1], 1 }
 0x199   :  { %746 = vsyncpa [#allocation6], 1 }
 0x19a   :  { %747 = vsyncpa [#allocation4], 1 }
 0x19b   :  { %749 = vsyncpa [#allocation4 + $0x1], 1 }

</bundles_post_ra>
